<compile_context>
chip_gen: v7x
topology: tpu7x:2x2x1
jax: 0.10.0
libtpu: 0.0.40
codegen_flags: <defaults>
</compile_context>

<pallas_src>
import functools

import jax
import jax.numpy as jnp
from jax import lax
from jax.experimental import pallas as pl
from jax.experimental.pallas import tpu as pltpu


def _round_up(a, b):
    return (a + b - 1) // b * b


# ---------------------------------------------------------------------------
# Host-side input preparation (cheap: ~1x input bytes for the stride-1 fast path)
# ---------------------------------------------------------------------------
def _prep_stride1(x_bf16, K, pad):
    """x: (N, Cin, H, W) bf16 -> (N, Cin, L) flattened padded images + zero tail."""
    N, Cin, H, W = x_bf16.shape
    Hp, Wp = H + 2 * pad, W + 2 * pad
    Ho, Wo = Hp - K + 1, Wp - K + 1
    Mc = _round_up(Hp * Wp, 128)                       # computed (padded-grid) columns
    L = _round_up(Mc + (K - 1) * (Wp + 1), 128)        # room for the largest (kh,kw) shift
    xp = jnp.pad(x_bf16, ((0, 0), (0, 0), (pad, pad), (pad, pad)))
    xf = xp.reshape(N, Cin, Hp * Wp)
    xf = jnp.pad(xf, ((0, 0), (0, 0), (0, L - Hp * Wp)))
    meta = dict(Ho=Ho, Wo=Wo, Wrow=Wp, Mc=Mc, L=L, Keff=K, Cin_eff=Cin)
    return xf, meta


def _prep_im2col(x_bf16, K, stride, pad):
    """Fallback (stride != 1): host im2col, row order (kh, kw, cin), per-image layout."""
    N, Cin, H, W = x_bf16.shape
    Ho = (H + 2 * pad - K) // stride + 1
    Wo = (W + 2 * pad - K) // stride + 1
    Mc = _round_up(Ho * Wo, 128)
    xp = jnp.pad(x_bf16, ((0, 0), (0, 0), (pad, pad), (pad, pad)))
    rows = []
    for kh in range(K):
        for kw in range(K):
            sl = xp[:, :, kh:kh + stride * Ho:stride, kw:kw + stride * Wo:stride]
            rows.append(sl.reshape(N, Cin, Ho * Wo))
    xf = jnp.concatenate(rows, axis=1)                 # (N, K*K*Cin, Ho*Wo)
    xf = jnp.pad(xf, ((0, 0), (0, 0), (0, Mc - Ho * Wo)))
    meta = dict(Ho=Ho, Wo=Wo, Wrow=Wo, Mc=Mc, L=Mc, Keff=1, Cin_eff=K * K * Cin)
    return xf, meta


# ---------------------------------------------------------------------------
# Kernels (built per call so shapes are baked in as Python constants)
# ---------------------------------------------------------------------------
def _make_kernels(Keff, Cin_eff, Wrow, Ho, Wo, Mc, KKC):
    def _operand(x_ref, patch_ref):
        # Build the (K*K*Cin, Mc) im2col block in VMEM from lane-shifted static slices of
        # the resident padded image block (VMEM-local relayouts, zero extra HBM traffic).
        if Keff == 1:
            return x_ref[0, :, 0:Mc]
        for kh in range(Keff):
            for kw in range(Keff):
                idx = kh * Keff + kw
                off = kh * Wrow + kw
                patch_ref[idx * Cin_eff:(idx + 1) * Cin_eff, :] = x_ref[0, :, off:off + Mc]
        return patch_ref[...]

    def stats_kernel(x_ref, w_ref, mask_ref, sum_ref, sq_ref, patch_ref):
        # x_ref: (1, Cin_eff, L) bf16; w_ref: (Ctot, KKC) bf16 (resident);
        # mask_ref: (1, Mc) f32; sum/sq: (1, Ctot, 1) f32 accumulators (resident).
        p = _operand(x_ref, patch_ref)
        y = jnp.dot(w_ref[...], p, preferred_element_type=jnp.float32)    # (Ctot, Mc) f32
        ym = y * mask_ref[...]                                            # zero invalid cols

        @pl.when(pl.program_id(1) == 0)
        def _init():
            sum_ref[...] = jnp.zeros_like(sum_ref)
            sq_ref[...] = jnp.zeros_like(sq_ref)

        sum_ref[...] += jnp.sum(ym, axis=1, keepdims=True)[None]
        sq_ref[...] += jnp.sum(ym * y, axis=1, keepdims=True)[None]

    def apply_kernel(x_ref, wf_ref, b_ref, o_ref, patch_ref):
        # wf_ref: (C_out, KKC) bf16 (BN affine + branch-sum folded); b_ref: (C_out, 1) f32.
        p = _operand(x_ref, patch_ref)
        y = jnp.dot(wf_ref[...], p, preferred_element_type=jnp.float32)   # (C_out, Mc)
        y = jnp.maximum(y + b_ref[...], 0.0).astype(o_ref.dtype)
        # Strip the padded columns and write directly into the NCHW output block.
        for oh in range(Ho):
            o_ref[0, :, oh, :] = y[:, oh * Wrow: oh * Wrow + Wo]

    return stats_kernel, apply_kernel


def _vmem_limit(Cin_eff, L, KKC, Mc, Ctot, C_out, Ho, Wo, Keff):
    patch = KKC * Mc * 2 if Keff > 1 else 8 * 128 * 2
    p1 = (2 * Cin_eff * L * 2 + 2 * Ctot * KKC * 2 + 2 * Mc * 4
          + 2 * 2 * Ctot * 4 + patch + 2 * Ctot * Mc * 4)
    p2 = (2 * Cin_eff * L * 2 + 2 * C_out * KKC * 2 + 2 * C_out * 4
          + 2 * C_out * Ho * Wo * 4 + patch + 2 * C_out * Mc * 4)
    need = max(p1, p2)
    return int(min(max(int(need * 1.5) + (4 << 20), 32 << 20), 96 << 20))


# ---------------------------------------------------------------------------
# Forward
# ---------------------------------------------------------------------------
def repvgg_block_forward(x, conv_weight, bn_gamma, bn_beta, *, stride=1, eps=1e-5):
    """Forward of RepVGGBlock_train (training mode, drop_path=0, groups=1, dilation=1).

    x: (N, Cin, H, W) f32; conv_weight: (Ctot, Cin, K, K) f32 with Ctot = C_out*(K//2+2);
    bn_gamma/bn_beta: (Ctot,) f32.  Returns (N, C_out, Ho, Wo) f32 in NCHW.
    """
    N, Cin, H, W = x.shape
    Ctot, Cin_w, K, K2 = conv_weight.shape
    assert Cin_w == Cin and K == K2
    kernels = K // 2 + 2
    C_out = Ctot // kernels
    pad = (K - 1) // 2

    xb = x.astype(jnp.bfloat16)
    if stride == 1:
        xf, meta = _prep_stride1(xb, K, pad)
    else:
        # TODO(synk): stride != 1 uses a host im2col fallback (correct, not the fast path).
        xf, meta = _prep_im2col(xb, K, stride, pad)
    Ho, Wo, Wrow = meta["Ho"], meta["Wo"], meta["Wrow"]
    Mc, L, Keff, Cin_eff = meta["Mc"], meta["L"], meta["Keff"], meta["Cin_eff"]
    KKC = K * K * Cin
    M = N * Ho * Wo

    # Valid-output-column mask over the Mc computed columns (host-built, tiny).
    q = jnp.arange(Mc, dtype=jnp.int32)
    mask = (((q // Wrow) < Ho) & ((q % Wrow) < Wo)).astype(jnp.float32).reshape(1, Mc)

    # conv weight -> (Ctot, K*K*Cin) with column order (kh, kw, cin) == patch row order.
    w2_f32 = jnp.transpose(conv_weight, (0, 2, 3, 1)).reshape(Ctot, KKC).astype(jnp.float32)
    w2_bf16 = w2_f32.astype(jnp.bfloat16)

    stats_kernel, apply_kernel = _make_kernels(Keff, Cin_eff, Wrow, Ho, Wo, Mc, KKC)
    vmem_limit = _vmem_limit(Cin_eff, L, KKC, Mc, Ctot, C_out, Ho, Wo, Keff)
    if Keff == 1:
        patch_scratch = pltpu.VMEM((8, 128), jnp.bfloat16)   # unused dummy in fallback path
    else:
        patch_scratch = pltpu.VMEM((KKC, Mc), jnp.bfloat16)

    # ---- phase 1: global per-channel sum / sum-of-squares of y = conv(x) ----------------
    parts = 2 if (N >= 2 and N % 2 == 0) else 1              # 2-TC split of the reduction
    n_per = N // parts
    stats_cost = pl.CostEstimate(
        flops=int(2 * N * Mc * KKC * Ctot), transcendentals=0,
        bytes_accessed=int(N * Cin_eff * L * 2 + Ctot * KKC * 2 + Mc * 4 + 2 * parts * Ctot * 4))

    sums, sqs = pl.pallas_call(
        stats_kernel,
        out_shape=(jax.ShapeDtypeStruct((parts, Ctot, 1), jnp.float32),
                   jax.ShapeDtypeStruct((parts, Ctot, 1), jnp.float32)),
        grid_spec=pltpu.PrefetchScalarGridSpec(
            num_scalar_prefetch=0,
            grid=(parts, n_per),
            in_specs=[pl.BlockSpec((1, Cin_eff, L), lambda p, j: (p * n_per + j, 0, 0)),
                      pl.BlockSpec((Ctot, KKC), lambda p, j: (0, 0)),
                      pl.BlockSpec((1, Mc), lambda p, j: (0, 0))],
            out_specs=(pl.BlockSpec((1, Ctot, 1), lambda p, j: (p, 0, 0)),
                       pl.BlockSpec((1, Ctot, 1), lambda p, j: (p, 0, 0))),
            scratch_shapes=[patch_scratch]),
        compiler_params=pltpu.CompilerParams(
            dimension_semantics=("parallel", "arbitrary"),
            vmem_limit_bytes=vmem_limit),
        cost_estimate=stats_cost,
    )(xf, w2_bf16, mask)

    # ---- tiny weight-sized ops: BN affine from batch stats, fold the branch sum ---------
    col_sum = jnp.sum(sums, axis=0)[:, 0]                         # (Ctot,)
    col_sq = jnp.sum(sqs, axis=0)[:, 0]
    mean = col_sum / M
    var = jnp.maximum(col_sq / M - mean * mean, 0.0)              # biased batch variance
    scale = bn_gamma.astype(jnp.float32) * lax.rsqrt(var + eps)
    shift = bn_beta.astype(jnp.float32) - mean * scale
    # out = sum_i (x*W_i)*scale_i + shift_i = x*(sum_i W_i*scale_i) + sum_i shift_i
    wf_bf16 = (w2_f32 * scale[:, None]).reshape(kernels, C_out, KKC).sum(axis=0).astype(jnp.bfloat16)
    bias = shift.reshape(kernels, C_out).sum(axis=0)[:, None]     # (C_out, 1) f32

    # ---- phase 2: conv with folded weight + bias + ReLU, direct NCHW output -------------
    apply_cost = pl.CostEstimate(
        flops=int(2 * N * Mc * KKC * C_out), transcendentals=0,
        bytes_accessed=int(N * Cin_eff * L * 2 + C_out * KKC * 2 + C_out * 4
                           + N * C_out * Ho * Wo * 4))

    out = pl.pallas_call(
        apply_kernel,
        out_shape=jax.ShapeDtypeStruct((N, C_out, Ho, Wo), jnp.float32),
        grid_spec=pltpu.PrefetchScalarGridSpec(
            num_scalar_prefetch=0,
            grid=(N,),
            in_specs=[pl.BlockSpec((1, Cin_eff, L), lambda n: (n, 0, 0)),
                      pl.BlockSpec((C_out, KKC), lambda n: (0, 0)),
                      pl.BlockSpec((C_out, 1), lambda n: (0, 0))],
            out_specs=pl.BlockSpec((1, C_out, Ho, Wo), lambda n: (n, 0, 0, 0)),
            scratch_shapes=[patch_scratch]),
        compiler_params=pltpu.CompilerParams(
            dimension_semantics=("parallel",),
            vmem_limit_bytes=vmem_limit),
        cost_estimate=apply_cost,
    )(xf, wf_bf16, bias)

    return out


# ---------------------------------------------------------------------------
# References for sanity checks
# ---------------------------------------------------------------------------
def _reference_module_f32(x, conv_weight, bn_gamma, bn_beta, *, stride=1, eps=1e-5):
    """Straight f32 transcription of the PyTorch module forward (training mode)."""
    Ctot, _, K, _ = conv_weight.shape
    kernels = K // 2 + 2
    C_out = Ctot // kernels
    pad = (K - 1) // 2
    y = lax.conv_general_dilated(
        x, conv_weight, window_strides=(stride, stride),
        padding=[(pad, pad), (pad, pad)],
        dimension_numbers=('NCHW', 'OIHW', 'NCHW'))
    mean = y.mean(axis=(0, 2, 3), keepdims=True)
    var = y.var(axis=(0, 2, 3), keepdims=True)        # biased, like PyTorch BN training
    y = (y - mean) * lax.rsqrt(var + eps)
    y = y * bn_gamma.reshape(1, -1, 1, 1) + bn_beta.reshape(1, -1, 1, 1)
    out = y[:, 0:C_out]
    for i in range(1, kernels):
        out = out + y[:, i * C_out:(i + 1) * C_out]
    return jnp.maximum(out, 0.0)


def _reference_matched(x, conv_weight, bn_gamma, bn_beta, *, stride=1, eps=1e-5):
    """Plain-JAX mirror of the Pallas algorithm/precision (bf16 operands, f32 accumulation,
    E[y^2]-E[y]^2 variance, BN + branch-sum folded into one bf16 weight)."""
    Ctot, Cin, K, _ = conv_weight.shape
    kernels = K // 2 + 2
    C_out = Ctot // kernels
    pad = (K - 1) // 2
    xb = x.astype(jnp.bfloat16)
    wb = conv_weight.astype(jnp.bfloat16)
    dn = ('NCHW', 'OIHW', 'NCHW')
    y = lax.conv_general_dilated(xb, wb, (stride, stride), [(pad, pad), (pad, pad)],
                                 dimension_numbers=dn, preferred_element_type=jnp.float32)
    M = y.shape[0] * y.shape[2] * y.shape[3]
    mean = jnp.sum(y, axis=(0, 2, 3)) / M
    var = jnp.maximum(jnp.sum(y * y, axis=(0, 2, 3)) / M - mean * mean, 0.0)
    scale = bn_gamma * lax.rsqrt(var + eps)
    shift = bn_beta - mean * scale
    w2 = jnp.transpose(conv_weight, (0, 2, 3, 1)).reshape(Ctot, K * K * Cin)
    wf = (w2 * scale[:, None]).reshape(kernels, C_out, K * K * Cin).sum(axis=0)
    wf4 = wf.reshape(C_out, K, K, Cin).transpose(0, 3, 1, 2).astype(jnp.bfloat16)
    bias = shift.reshape(kernels, C_out).sum(axis=0)
    out = lax.conv_general_dilated(xb, wf4, (stride, stride), [(pad, pad), (pad, pad)],
                                   dimension_numbers=dn, preferred_element_type=jnp.float32)
    return jnp.maximum(out + bias.reshape(1, -1, 1, 1), 0.0)


if __name__ == "__main__":
    # Small shapes consistent with the module defaults.
    N, Cin, H, W = 2, 4, 16, 16
    out_channels, kernel_size, stride = 8, 3, 1
    kernels = kernel_size // 2 + 2                     # 3
    conv_out_channels = out_channels * kernels         # 24

    key = jax.random.PRNGKey(0)
    kx, kw_, kg, kb = jax.random.split(key, 4)
    x = jax.random.normal(kx, (N, Cin, H, W), dtype=jnp.float32)
    fan_in = Cin * kernel_size * kernel_size
    conv_weight = jax.random.normal(
        kw_, (conv_out_channels, Cin, kernel_size, kernel_size),
        dtype=jnp.float32) * (2.0 / fan_in) ** 0.5     # Kaiming-like, deterministic
    bn_gamma = 1.0 + 0.1 * jax.random.normal(kg, (conv_out_channels,), jnp.float32)
    bn_beta = 0.1 * jax.random.normal(kb, (conv_out_channels,), jnp.float32)

    fwd = jax.jit(functools.partial(repvgg_block_forward, stride=stride))
    out = jax.block_until_ready(fwd(x, conv_weight, bn_gamma, bn_beta))

    ref_matched = _reference_matched(x, conv_weight, bn_gamma, bn_beta, stride=stride)
    ref_f32 = _reference_module_f32(x, conv_weight, bn_gamma, bn_beta, stride=stride)

    assert out.shape == (N, out_channels, H, W)
    # Matched-precision check (validates tiling / in-kernel im2col / BN fold).  Tolerance is
    # 2e-2 (not tighter) because the folded weight is re-quantized to bf16 and a last-ulp
    # difference in the batch-stat scale can flip individual bf16 roundings.
    assert bool(jnp.allclose(out, ref_matched, atol=2e-2, rtol=2e-2)), \
        "mismatch vs matched-precision reference"
    # Semantic check vs exact f32 module math; gap is the intentional bf16 operand cast.
    assert bool(jnp.allclose(out, ref_f32, atol=4e-2, rtol=4e-2)), \
        "mismatch vs f32 module reference"

    print("KERNEL_OK")
</pallas_src>

<mosaic_0001>
module attributes {stable_mosaic.version = 11 : i64} {
  func.func @apply_kernel(%arg0: i32, %arg1: memref<1x4x512xbf16, #tpu.memory_space<vmem>>, %arg2: memref<8x36xbf16, #tpu.memory_space<vmem>>, %arg3: memref<8x1xf32, #tpu.memory_space<vmem>>, %arg4: memref<1x8x16x16xf32, #tpu.memory_space<vmem>>, %arg5: memref<36x384xbf16, #tpu.memory_space<vmem>>) attributes {dimension_semantics = [#tpu.dimension_semantics<parallel>], iteration_bounds = array<i64: 2>, scalar_prefetch = 0 : i64, scratch_operands = 1 : i64, tpu.core_type = #tpu.core_type<tc>, window_params = [{transform_indices = @transform_0, window_bounds = array<i64: 1, 4, 512>}, {pipeline_mode = #tpu.pipeline_mode<synchronous>, transform_indices = @transform_1, window_bounds = array<i64: 8, 36>}, {pipeline_mode = #tpu.pipeline_mode<synchronous>, transform_indices = @transform_2, window_bounds = array<i64: 8, 1>}, {transform_indices = @transform_3, window_bounds = array<i64: 1, 8, 16, 16>}]} {
    %c0 = arith.constant 0 : index
    %c0_0 = arith.constant 0 : index
    %c0_1 = arith.constant 0 : index
    %0 = vector.load %arg1[%c0, %c0_0, %c0_1] : memref<1x4x512xbf16, #tpu.memory_space<vmem>>, vector<1x4x384xbf16>
    %1 = vector.shape_cast %0 : vector<1x4x384xbf16> to vector<4x384xbf16>
    %c0_2 = arith.constant 0 : index
    %c0_3 = arith.constant 0 : index
    %2 = vector.load %arg5[%c0_2, %c0_3] : memref<36x384xbf16, #tpu.memory_space<vmem>>, vector<4x384xbf16>
    tpu.vector_store %arg5[%c0_2, %c0_3], %1 {strides = array<i32>} : memref<36x384xbf16, #tpu.memory_space<vmem>>, vector<4x384xbf16>,
    %c0_4 = arith.constant 0 : index
    %c0_5 = arith.constant 0 : index
    %c1 = arith.constant 1 : index
    %3 = vector.load %arg1[%c0_4, %c0_5, %c1] : memref<1x4x512xbf16, #tpu.memory_space<vmem>>, vector<1x4x384xbf16>
    %4 = vector.shape_cast %3 : vector<1x4x384xbf16> to vector<4x384xbf16>
    %c4 = arith.constant 4 : index
    %c0_6 = arith.constant 0 : index
    %5 = vector.load %arg5[%c4, %c0_6] : memref<36x384xbf16, #tpu.memory_space<vmem>>, vector<4x384xbf16>
    tpu.vector_store %arg5[%c4, %c0_6], %4 {strides = array<i32>} : memref<36x384xbf16, #tpu.memory_space<vmem>>, vector<4x384xbf16>,
    %c0_7 = arith.constant 0 : index
    %c0_8 = arith.constant 0 : index
    %c2 = arith.constant 2 : index
    %6 = vector.load %arg1[%c0_7, %c0_8, %c2] : memref<1x4x512xbf16, #tpu.memory_space<vmem>>, vector<1x4x384xbf16>
    %7 = vector.shape_cast %6 : vector<1x4x384xbf16> to vector<4x384xbf16>
    %c8 = arith.constant 8 : index
    %c0_9 = arith.constant 0 : index
    %8 = vector.load %arg5[%c8, %c0_9] : memref<36x384xbf16, #tpu.memory_space<vmem>>, vector<4x384xbf16>
    tpu.vector_store %arg5[%c8, %c0_9], %7 {strides = array<i32>} : memref<36x384xbf16, #tpu.memory_space<vmem>>, vector<4x384xbf16>,
    %c0_10 = arith.constant 0 : index
    %c0_11 = arith.constant 0 : index
    %c18 = arith.constant 18 : index
    %9 = vector.load %arg1[%c0_10, %c0_11, %c18] : memref<1x4x512xbf16, #tpu.memory_space<vmem>>, vector<1x4x384xbf16>
    %10 = vector.shape_cast %9 : vector<1x4x384xbf16> to vector<4x384xbf16>
    %c12 = arith.constant 12 : index
    %c0_12 = arith.constant 0 : index
    %11 = vector.load %arg5[%c12, %c0_12] : memref<36x384xbf16, #tpu.memory_space<vmem>>, vector<4x384xbf16>
    tpu.vector_store %arg5[%c12, %c0_12], %10 {strides = array<i32>} : memref<36x384xbf16, #tpu.memory_space<vmem>>, vector<4x384xbf16>,
    %c0_13 = arith.constant 0 : index
    %c0_14 = arith.constant 0 : index
    %c19 = arith.constant 19 : index
    %12 = vector.load %arg1[%c0_13, %c0_14, %c19] : memref<1x4x512xbf16, #tpu.memory_space<vmem>>, vector<1x4x384xbf16>
    %13 = vector.shape_cast %12 : vector<1x4x384xbf16> to vector<4x384xbf16>
    %c16 = arith.constant 16 : index
    %c0_15 = arith.constant 0 : index
    %14 = vector.load %arg5[%c16, %c0_15] : memref<36x384xbf16, #tpu.memory_space<vmem>>, vector<4x384xbf16>
    tpu.vector_store %arg5[%c16, %c0_15], %13 {strides = array<i32>} : memref<36x384xbf16, #tpu.memory_space<vmem>>, vector<4x384xbf16>,
    %c0_16 = arith.constant 0 : index
    %c0_17 = arith.constant 0 : index
    %c20 = arith.constant 20 : index
    %15 = vector.load %arg1[%c0_16, %c0_17, %c20] : memref<1x4x512xbf16, #tpu.memory_space<vmem>>, vector<1x4x384xbf16>
    %16 = vector.shape_cast %15 : vector<1x4x384xbf16> to vector<4x384xbf16>
    %c20_18 = arith.constant 20 : index
    %c0_19 = arith.constant 0 : index
    %17 = vector.load %arg5[%c20_18, %c0_19] : memref<36x384xbf16, #tpu.memory_space<vmem>>, vector<4x384xbf16>
    tpu.vector_store %arg5[%c20_18, %c0_19], %16 {strides = array<i32>} : memref<36x384xbf16, #tpu.memory_space<vmem>>, vector<4x384xbf16>,
    %c0_20 = arith.constant 0 : index
    %c0_21 = arith.constant 0 : index
    %c36 = arith.constant 36 : index
    %18 = vector.load %arg1[%c0_20, %c0_21, %c36] : memref<1x4x512xbf16, #tpu.memory_space<vmem>>, vector<1x4x384xbf16>
    %19 = vector.shape_cast %18 : vector<1x4x384xbf16> to vector<4x384xbf16>
    %c24 = arith.constant 24 : index
    %c0_22 = arith.constant 0 : index
    %20 = vector.load %arg5[%c24, %c0_22] : memref<36x384xbf16, #tpu.memory_space<vmem>>, vector<4x384xbf16>
    tpu.vector_store %arg5[%c24, %c0_22], %19 {strides = array<i32>} : memref<36x384xbf16, #tpu.memory_space<vmem>>, vector<4x384xbf16>,
    %c0_23 = arith.constant 0 : index
    %c0_24 = arith.constant 0 : index
    %c37 = arith.constant 37 : index
    %21 = vector.load %arg1[%c0_23, %c0_24, %c37] : memref<1x4x512xbf16, #tpu.memory_space<vmem>>, vector<1x4x384xbf16>
    %22 = vector.shape_cast %21 : vector<1x4x384xbf16> to vector<4x384xbf16>
    %c28 = arith.constant 28 : index
    %c0_25 = arith.constant 0 : index
    %23 = vector.load %arg5[%c28, %c0_25] : memref<36x384xbf16, #tpu.memory_space<vmem>>, vector<4x384xbf16>
    tpu.vector_store %arg5[%c28, %c0_25], %22 {strides = array<i32>} : memref<36x384xbf16, #tpu.memory_space<vmem>>, vector<4x384xbf16>,
    %c0_26 = arith.constant 0 : index
    %c0_27 = arith.constant 0 : index
    %c38 = arith.constant 38 : index
    %24 = vector.load %arg1[%c0_26, %c0_27, %c38] : memref<1x4x512xbf16, #tpu.memory_space<vmem>>, vector<1x4x384xbf16>
    %25 = vector.shape_cast %24 : vector<1x4x384xbf16> to vector<4x384xbf16>
    %c32 = arith.constant 32 : index
    %c0_28 = arith.constant 0 : index
    %26 = vector.load %arg5[%c32, %c0_28] : memref<36x384xbf16, #tpu.memory_space<vmem>>, vector<4x384xbf16>
    tpu.vector_store %arg5[%c32, %c0_28], %25 {strides = array<i32>} : memref<36x384xbf16, #tpu.memory_space<vmem>>, vector<4x384xbf16>,
    %c0_29 = arith.constant 0 : index
    %c0_30 = arith.constant 0 : index
    %27 = vector.load %arg5[%c0_29, %c0_30] : memref<36x384xbf16, #tpu.memory_space<vmem>>, vector<36x384xbf16>
    %c0_31 = arith.constant 0 : index
    %c0_32 = arith.constant 0 : index
    %28 = vector.load %arg2[%c0_31, %c0_32] : memref<8x36xbf16, #tpu.memory_space<vmem>>, vector<8x36xbf16>
    %cst = arith.constant dense<0.000000e+00> : vector<8x384xf32>
    %29 = tpu.matmul %28, %27, %cst {dimension_numbers = #tpu.dot_dimension_numbers<[1], [0], [0], [1], [0, 0, 1, 1], [], []>} : vector<8x36xbf16>, vector<36x384xbf16>, vector<8x384xf32> -> vector<8x384xf32>
    %c0_33 = arith.constant 0 : index
    %c0_34 = arith.constant 0 : index
    %30 = vector.load %arg3[%c0_33, %c0_34] : memref<8x1xf32, #tpu.memory_space<vmem>>, vector<8x1xf32>
    %31 = vector.broadcast %30 : vector<8x1xf32> to vector<8x384xf32>
    %32 = arith.addf %29, %31 : vector<8x384xf32>
    %cst_35 = arith.constant 0.000000e+00 : f32
    %33 = vector.broadcast %cst_35 : f32 to vector<8x384xf32>
    %34 = arith.maximumf %32, %33 : vector<8x384xf32>
    %35 = vector.extract_strided_slice %34 {offsets = [0, 0], sizes = [8, 16], strides = [1, 1]} : vector<8x384xf32> to vector<8x16xf32>
    %c0_36 = arith.constant 0 : index
    %c0_37 = arith.constant 0 : index
    %c0_38 = arith.constant 0 : index
    %c0_39 = arith.constant 0 : index
    %36 = vector.load %arg4[%c0_36, %c0_37, %c0_38, %c0_39] : memref<1x8x16x16xf32, #tpu.memory_space<vmem>>, vector<1x8x1x16xf32>
    %37 = vector.shape_cast %36 : vector<1x8x1x16xf32> to vector<8x16xf32>
    %38 = vector.shape_cast %35 : vector<8x16xf32> to vector<1x8x1x16xf32>
    tpu.vector_store %arg4[%c0_36, %c0_37, %c0_38, %c0_39], %38 {strides = array<i32>} : memref<1x8x16x16xf32, #tpu.memory_space<vmem>>, vector<1x8x1x16xf32>,
    %39 = vector.extract_strided_slice %34 {offsets = [0, 18], sizes = [8, 16], strides = [1, 1]} : vector<8x384xf32> to vector<8x16xf32>
    %c0_40 = arith.constant 0 : index
    %c0_41 = arith.constant 0 : index
    %c1_42 = arith.constant 1 : index
    %c0_43 = arith.constant 0 : index
    %40 = vector.load %arg4[%c0_40, %c0_41, %c1_42, %c0_43] : memref<1x8x16x16xf32, #tpu.memory_space<vmem>>, vector<1x8x1x16xf32>
    %41 = vector.shape_cast %40 : vector<1x8x1x16xf32> to vector<8x16xf32>
    %42 = vector.shape_cast %39 : vector<8x16xf32> to vector<1x8x1x16xf32>
    tpu.vector_store %arg4[%c0_40, %c0_41, %c1_42, %c0_43], %42 {strides = array<i32>} : memref<1x8x16x16xf32, #tpu.memory_space<vmem>>, vector<1x8x1x16xf32>,
    %43 = vector.extract_strided_slice %34 {offsets = [0, 36], sizes = [8, 16], strides = [1, 1]} : vector<8x384xf32> to vector<8x16xf32>
    %c0_44 = arith.constant 0 : index
    %c0_45 = arith.constant 0 : index
    %c2_46 = arith.constant 2 : index
    %c0_47 = arith.constant 0 : index
    %44 = vector.load %arg4[%c0_44, %c0_45, %c2_46, %c0_47] : memref<1x8x16x16xf32, #tpu.memory_space<vmem>>, vector<1x8x1x16xf32>
    %45 = vector.shape_cast %44 : vector<1x8x1x16xf32> to vector<8x16xf32>
    %46 = vector.shape_cast %43 : vector<8x16xf32> to vector<1x8x1x16xf32>
    tpu.vector_store %arg4[%c0_44, %c0_45, %c2_46, %c0_47], %46 {strides = array<i32>} : memref<1x8x16x16xf32, #tpu.memory_space<vmem>>, vector<1x8x1x16xf32>,
    %47 = vector.extract_strided_slice %34 {offsets = [0, 54], sizes = [8, 16], strides = [1, 1]} : vector<8x384xf32> to vector<8x16xf32>
    %c0_48 = arith.constant 0 : index
    %c0_49 = arith.constant 0 : index
    %c3 = arith.constant 3 : index
    %c0_50 = arith.constant 0 : index
    %48 = vector.load %arg4[%c0_48, %c0_49, %c3, %c0_50] : memref<1x8x16x16xf32, #tpu.memory_space<vmem>>, vector<1x8x1x16xf32>
    %49 = vector.shape_cast %48 : vector<1x8x1x16xf32> to vector<8x16xf32>
    %50 = vector.shape_cast %47 : vector<8x16xf32> to vector<1x8x1x16xf32>
    tpu.vector_store %arg4[%c0_48, %c0_49, %c3, %c0_50], %50 {strides = array<i32>} : memref<1x8x16x16xf32, #tpu.memory_space<vmem>>, vector<1x8x1x16xf32>,
    %51 = vector.extract_strided_slice %34 {offsets = [0, 72], sizes = [8, 16], strides = [1, 1]} : vector<8x384xf32> to vector<8x16xf32>
    %c0_51 = arith.constant 0 : index
    %c0_52 = arith.constant 0 : index
    %c4_53 = arith.constant 4 : index
    %c0_54 = arith.constant 0 : index
    %52 = vector.load %arg4[%c0_51, %c0_52, %c4_53, %c0_54] : memref<1x8x16x16xf32, #tpu.memory_space<vmem>>, vector<1x8x1x16xf32>
    %53 = vector.shape_cast %52 : vector<1x8x1x16xf32> to vector<8x16xf32>
    %54 = vector.shape_cast %51 : vector<8x16xf32> to vector<1x8x1x16xf32>
    tpu.vector_store %arg4[%c0_51, %c0_52, %c4_53, %c0_54], %54 {strides = array<i32>} : memref<1x8x16x16xf32, #tpu.memory_space<vmem>>, vector<1x8x1x16xf32>,
    %55 = vector.extract_strided_slice %34 {offsets = [0, 90], sizes = [8, 16], strides = [1, 1]} : vector<8x384xf32> to vector<8x16xf32>
    %c0_55 = arith.constant 0 : index
    %c0_56 = arith.constant 0 : index
    %c5 = arith.constant 5 : index
    %c0_57 = arith.constant 0 : index
    %56 = vector.load %arg4[%c0_55, %c0_56, %c5, %c0_57] : memref<1x8x16x16xf32, #tpu.memory_space<vmem>>, vector<1x8x1x16xf32>
    %57 = vector.shape_cast %56 : vector<1x8x1x16xf32> to vector<8x16xf32>
    %58 = vector.shape_cast %55 : vector<8x16xf32> to vector<1x8x1x16xf32>
    tpu.vector_store %arg4[%c0_55, %c0_56, %c5, %c0_57], %58 {strides = array<i32>} : memref<1x8x16x16xf32, #tpu.memory_space<vmem>>, vector<1x8x1x16xf32>,
    %59 = vector.extract_strided_slice %34 {offsets = [0, 108], sizes = [8, 16], strides = [1, 1]} : vector<8x384xf32> to vector<8x16xf32>
    %c0_58 = arith.constant 0 : index
    %c0_59 = arith.constant 0 : index
    %c6 = arith.constant 6 : index
    %c0_60 = arith.constant 0 : index
    %60 = vector.load %arg4[%c0_58, %c0_59, %c6, %c0_60] : memref<1x8x16x16xf32, #tpu.memory_space<vmem>>, vector<1x8x1x16xf32>
    %61 = vector.shape_cast %60 : vector<1x8x1x16xf32> to vector<8x16xf32>
    %62 = vector.shape_cast %59 : vector<8x16xf32> to vector<1x8x1x16xf32>
    tpu.vector_store %arg4[%c0_58, %c0_59, %c6, %c0_60], %62 {strides = array<i32>} : memref<1x8x16x16xf32, #tpu.memory_space<vmem>>, vector<1x8x1x16xf32>,
    %63 = vector.extract_strided_slice %34 {offsets = [0, 126], sizes = [8, 16], strides = [1, 1]} : vector<8x384xf32> to vector<8x16xf32>
    %c0_61 = arith.constant 0 : index
    %c0_62 = arith.constant 0 : index
    %c7 = arith.constant 7 : index
    %c0_63 = arith.constant 0 : index
    %64 = vector.load %arg4[%c0_61, %c0_62, %c7, %c0_63] : memref<1x8x16x16xf32, #tpu.memory_space<vmem>>, vector<1x8x1x16xf32>
    %65 = vector.shape_cast %64 : vector<1x8x1x16xf32> to vector<8x16xf32>
    %66 = vector.shape_cast %63 : vector<8x16xf32> to vector<1x8x1x16xf32>
    tpu.vector_store %arg4[%c0_61, %c0_62, %c7, %c0_63], %66 {strides = array<i32>} : memref<1x8x16x16xf32, #tpu.memory_space<vmem>>, vector<1x8x1x16xf32>,
    %67 = vector.extract_strided_slice %34 {offsets = [0, 144], sizes = [8, 16], strides = [1, 1]} : vector<8x384xf32> to vector<8x16xf32>
    %c0_64 = arith.constant 0 : index
    %c0_65 = arith.constant 0 : index
    %c8_66 = arith.constant 8 : index
    %c0_67 = arith.constant 0 : index
    %68 = vector.load %arg4[%c0_64, %c0_65, %c8_66, %c0_67] : memref<1x8x16x16xf32, #tpu.memory_space<vmem>>, vector<1x8x1x16xf32>
    %69 = vector.shape_cast %68 : vector<1x8x1x16xf32> to vector<8x16xf32>
    %70 = vector.shape_cast %67 : vector<8x16xf32> to vector<1x8x1x16xf32>
    tpu.vector_store %arg4[%c0_64, %c0_65, %c8_66, %c0_67], %70 {strides = array<i32>} : memref<1x8x16x16xf32, #tpu.memory_space<vmem>>, vector<1x8x1x16xf32>,
    %71 = vector.extract_strided_slice %34 {offsets = [0, 162], sizes = [8, 16], strides = [1, 1]} : vector<8x384xf32> to vector<8x16xf32>
    %c0_68 = arith.constant 0 : index
    %c0_69 = arith.constant 0 : index
    %c9 = arith.constant 9 : index
    %c0_70 = arith.constant 0 : index
    %72 = vector.load %arg4[%c0_68, %c0_69, %c9, %c0_70] : memref<1x8x16x16xf32, #tpu.memory_space<vmem>>, vector<1x8x1x16xf32>
    %73 = vector.shape_cast %72 : vector<1x8x1x16xf32> to vector<8x16xf32>
    %74 = vector.shape_cast %71 : vector<8x16xf32> to vector<1x8x1x16xf32>
    tpu.vector_store %arg4[%c0_68, %c0_69, %c9, %c0_70], %74 {strides = array<i32>} : memref<1x8x16x16xf32, #tpu.memory_space<vmem>>, vector<1x8x1x16xf32>,
    %75 = vector.extract_strided_slice %34 {offsets = [0, 180], sizes = [8, 16], strides = [1, 1]} : vector<8x384xf32> to vector<8x16xf32>
    %c0_71 = arith.constant 0 : index
    %c0_72 = arith.constant 0 : index
    %c10 = arith.constant 10 : index
    %c0_73 = arith.constant 0 : index
    %76 = vector.load %arg4[%c0_71, %c0_72, %c10, %c0_73] : memref<1x8x16x16xf32, #tpu.memory_space<vmem>>, vector<1x8x1x16xf32>
    %77 = vector.shape_cast %76 : vector<1x8x1x16xf32> to vector<8x16xf32>
    %78 = vector.shape_cast %75 : vector<8x16xf32> to vector<1x8x1x16xf32>
    tpu.vector_store %arg4[%c0_71, %c0_72, %c10, %c0_73], %78 {strides = array<i32>} : memref<1x8x16x16xf32, #tpu.memory_space<vmem>>, vector<1x8x1x16xf32>,
    %79 = vector.extract_strided_slice %34 {offsets = [0, 198], sizes = [8, 16], strides = [1, 1]} : vector<8x384xf32> to vector<8x16xf32>
    %c0_74 = arith.constant 0 : index
    %c0_75 = arith.constant 0 : index
    %c11 = arith.constant 11 : index
    %c0_76 = arith.constant 0 : index
    %80 = vector.load %arg4[%c0_74, %c0_75, %c11, %c0_76] : memref<1x8x16x16xf32, #tpu.memory_space<vmem>>, vector<1x8x1x16xf32>
    %81 = vector.shape_cast %80 : vector<1x8x1x16xf32> to vector<8x16xf32>
    %82 = vector.shape_cast %79 : vector<8x16xf32> to vector<1x8x1x16xf32>
    tpu.vector_store %arg4[%c0_74, %c0_75, %c11, %c0_76], %82 {strides = array<i32>} : memref<1x8x16x16xf32, #tpu.memory_space<vmem>>, vector<1x8x1x16xf32>,
    %83 = vector.extract_strided_slice %34 {offsets = [0, 216], sizes = [8, 16], strides = [1, 1]} : vector<8x384xf32> to vector<8x16xf32>
    %c0_77 = arith.constant 0 : index
    %c0_78 = arith.constant 0 : index
    %c12_79 = arith.constant 12 : index
    %c0_80 = arith.constant 0 : index
    %84 = vector.load %arg4[%c0_77, %c0_78, %c12_79, %c0_80] : memref<1x8x16x16xf32, #tpu.memory_space<vmem>>, vector<1x8x1x16xf32>
    %85 = vector.shape_cast %84 : vector<1x8x1x16xf32> to vector<8x16xf32>
    %86 = vector.shape_cast %83 : vector<8x16xf32> to vector<1x8x1x16xf32>
    tpu.vector_store %arg4[%c0_77, %c0_78, %c12_79, %c0_80], %86 {strides = array<i32>} : memref<1x8x16x16xf32, #tpu.memory_space<vmem>>, vector<1x8x1x16xf32>,
    %87 = vector.extract_strided_slice %34 {offsets = [0, 234], sizes = [8, 16], strides = [1, 1]} : vector<8x384xf32> to vector<8x16xf32>
    %c0_81 = arith.constant 0 : index
    %c0_82 = arith.constant 0 : index
    %c13 = arith.constant 13 : index
    %c0_83 = arith.constant 0 : index
    %88 = vector.load %arg4[%c0_81, %c0_82, %c13, %c0_83] : memref<1x8x16x16xf32, #tpu.memory_space<vmem>>, vector<1x8x1x16xf32>
    %89 = vector.shape_cast %88 : vector<1x8x1x16xf32> to vector<8x16xf32>
    %90 = vector.shape_cast %87 : vector<8x16xf32> to vector<1x8x1x16xf32>
    tpu.vector_store %arg4[%c0_81, %c0_82, %c13, %c0_83], %90 {strides = array<i32>} : memref<1x8x16x16xf32, #tpu.memory_space<vmem>>, vector<1x8x1x16xf32>,
    %91 = vector.extract_strided_slice %34 {offsets = [0, 252], sizes = [8, 16], strides = [1, 1]} : vector<8x384xf32> to vector<8x16xf32>
    %c0_84 = arith.constant 0 : index
    %c0_85 = arith.constant 0 : index
    %c14 = arith.constant 14 : index
    %c0_86 = arith.constant 0 : index
    %92 = vector.load %arg4[%c0_84, %c0_85, %c14, %c0_86] : memref<1x8x16x16xf32, #tpu.memory_space<vmem>>, vector<1x8x1x16xf32>
    %93 = vector.shape_cast %92 : vector<1x8x1x16xf32> to vector<8x16xf32>
    %94 = vector.shape_cast %91 : vector<8x16xf32> to vector<1x8x1x16xf32>
    tpu.vector_store %arg4[%c0_84, %c0_85, %c14, %c0_86], %94 {strides = array<i32>} : memref<1x8x16x16xf32, #tpu.memory_space<vmem>>, vector<1x8x1x16xf32>,
    %95 = vector.extract_strided_slice %34 {offsets = [0, 270], sizes = [8, 16], strides = [1, 1]} : vector<8x384xf32> to vector<8x16xf32>
    %c0_87 = arith.constant 0 : index
    %c0_88 = arith.constant 0 : index
    %c15 = arith.constant 15 : index
    %c0_89 = arith.constant 0 : index
    %96 = vector.load %arg4[%c0_87, %c0_88, %c15, %c0_89] : memref<1x8x16x16xf32, #tpu.memory_space<vmem>>, vector<1x8x1x16xf32>
    %97 = vector.shape_cast %96 : vector<1x8x1x16xf32> to vector<8x16xf32>
    %98 = vector.shape_cast %95 : vector<8x16xf32> to vector<1x8x1x16xf32>
    tpu.vector_store %arg4[%c0_87, %c0_88, %c15, %c0_89], %98 {strides = array<i32>} : memref<1x8x16x16xf32, #tpu.memory_space<vmem>>, vector<1x8x1x16xf32>,
    return
  }
  func.func @transform_0(%arg0: i32) -> (i32, i32, i32) {
    %c0_i32 = arith.constant 0 : i32
    %c0_i32_0 = arith.constant 0 : i32
    %c0_i32_1 = arith.constant 0 : i32
    return %arg0, %c0_i32, %c0_i32_0 : i32, i32, i32
  }
  func.func @transform_1(%arg0: i32) -> (i32, i32) {
    %c0_i32 = arith.constant 0 : i32
    %c0_i32_0 = arith.constant 0 : i32
    %c0_i32_1 = arith.constant 0 : i32
    return %c0_i32, %c0_i32_0 : i32, i32
  }
  func.func @transform_2(%arg0: i32) -> (i32, i32) {
    %c0_i32 = arith.constant 0 : i32
    %c0_i32_0 = arith.constant 0 : i32
    %c0_i32_1 = arith.constant 0 : i32
    return %c0_i32, %c0_i32_0 : i32, i32
  }
  func.func @transform_3(%arg0: i32) -> (i32, i32, i32, i32) {
    %c0_i32 = arith.constant 0 : i32
    %c0_i32_0 = arith.constant 0 : i32
    %c0_i32_1 = arith.constant 0 : i32
    %c0_i32_2 = arith.constant 0 : i32
    return %arg0, %c0_i32, %c0_i32_0, %c0_i32_1 : i32, i32, i32, i32
  }
}

module attributes {stable_mosaic.version = 11 : i64} {
  func.func @stats_kernel(%arg0: i32, %arg1: i32, %arg2: memref<1x4x512xbf16, #tpu.memory_space<vmem>>, %arg3: memref<24x36xbf16, #tpu.memory_space<vmem>>, %arg4: memref<1x384xf32, #tpu.memory_space<vmem>>, %arg5: memref<1x24x1xf32, #tpu.memory_space<vmem>>, %arg6: memref<1x24x1xf32, #tpu.memory_space<vmem>>, %arg7: memref<36x384xbf16, #tpu.memory_space<vmem>>) attributes {dimension_semantics = [#tpu.dimension_semantics<parallel>, #tpu.dimension_semantics<arbitrary>], iteration_bounds = array<i64: 2, 1>, scalar_prefetch = 0 : i64, scratch_operands = 1 : i64, tpu.core_type = #tpu.core_type<tc>, window_params = [{transform_indices = @transform_0, window_bounds = array<i64: 1, 4, 512>}, {pipeline_mode = #tpu.pipeline_mode<synchronous>, transform_indices = @transform_1, window_bounds = array<i64: 24, 36>}, {pipeline_mode = #tpu.pipeline_mode<synchronous>, transform_indices = @transform_2, window_bounds = array<i64: 1, 384>}, {transform_indices = @transform_3, window_bounds = array<i64: 1, 24, 1>}, {transform_indices = @transform_4, window_bounds = array<i64: 1, 24, 1>}]} {
    %c0 = arith.constant 0 : index
    %c0_0 = arith.constant 0 : index
    %c0_1 = arith.constant 0 : index
    %0 = vector.load %arg2[%c0, %c0_0, %c0_1] : memref<1x4x512xbf16, #tpu.memory_space<vmem>>, vector<1x4x384xbf16>
    %1 = vector.shape_cast %0 : vector<1x4x384xbf16> to vector<4x384xbf16>
    %c0_2 = arith.constant 0 : index
    %c0_3 = arith.constant 0 : index
    %2 = vector.load %arg7[%c0_2, %c0_3] : memref<36x384xbf16, #tpu.memory_space<vmem>>, vector<4x384xbf16>
    tpu.vector_store %arg7[%c0_2, %c0_3], %1 {strides = array<i32>} : memref<36x384xbf16, #tpu.memory_space<vmem>>, vector<4x384xbf16>,
    %c0_4 = arith.constant 0 : index
    %c0_5 = arith.constant 0 : index
    %c1 = arith.constant 1 : index
    %3 = vector.load %arg2[%c0_4, %c0_5, %c1] : memref<1x4x512xbf16, #tpu.memory_space<vmem>>, vector<1x4x384xbf16>
    %4 = vector.shape_cast %3 : vector<1x4x384xbf16> to vector<4x384xbf16>
    %c4 = arith.constant 4 : index
    %c0_6 = arith.constant 0 : index
    %5 = vector.load %arg7[%c4, %c0_6] : memref<36x384xbf16, #tpu.memory_space<vmem>>, vector<4x384xbf16>
    tpu.vector_store %arg7[%c4, %c0_6], %4 {strides = array<i32>} : memref<36x384xbf16, #tpu.memory_space<vmem>>, vector<4x384xbf16>,
    %c0_7 = arith.constant 0 : index
    %c0_8 = arith.constant 0 : index
    %c2 = arith.constant 2 : index
    %6 = vector.load %arg2[%c0_7, %c0_8, %c2] : memref<1x4x512xbf16, #tpu.memory_space<vmem>>, vector<1x4x384xbf16>
    %7 = vector.shape_cast %6 : vector<1x4x384xbf16> to vector<4x384xbf16>
    %c8 = arith.constant 8 : index
    %c0_9 = arith.constant 0 : index
    %8 = vector.load %arg7[%c8, %c0_9] : memref<36x384xbf16, #tpu.memory_space<vmem>>, vector<4x384xbf16>
    tpu.vector_store %arg7[%c8, %c0_9], %7 {strides = array<i32>} : memref<36x384xbf16, #tpu.memory_space<vmem>>, vector<4x384xbf16>,
    %c0_10 = arith.constant 0 : index
    %c0_11 = arith.constant 0 : index
    %c18 = arith.constant 18 : index
    %9 = vector.load %arg2[%c0_10, %c0_11, %c18] : memref<1x4x512xbf16, #tpu.memory_space<vmem>>, vector<1x4x384xbf16>
    %10 = vector.shape_cast %9 : vector<1x4x384xbf16> to vector<4x384xbf16>
    %c12 = arith.constant 12 : index
    %c0_12 = arith.constant 0 : index
    %11 = vector.load %arg7[%c12, %c0_12] : memref<36x384xbf16, #tpu.memory_space<vmem>>, vector<4x384xbf16>
    tpu.vector_store %arg7[%c12, %c0_12], %10 {strides = array<i32>} : memref<36x384xbf16, #tpu.memory_space<vmem>>, vector<4x384xbf16>,
    %c0_13 = arith.constant 0 : index
    %c0_14 = arith.constant 0 : index
    %c19 = arith.constant 19 : index
    %12 = vector.load %arg2[%c0_13, %c0_14, %c19] : memref<1x4x512xbf16, #tpu.memory_space<vmem>>, vector<1x4x384xbf16>
    %13 = vector.shape_cast %12 : vector<1x4x384xbf16> to vector<4x384xbf16>
    %c16 = arith.constant 16 : index
    %c0_15 = arith.constant 0 : index
    %14 = vector.load %arg7[%c16, %c0_15] : memref<36x384xbf16, #tpu.memory_space<vmem>>, vector<4x384xbf16>
    tpu.vector_store %arg7[%c16, %c0_15], %13 {strides = array<i32>} : memref<36x384xbf16, #tpu.memory_space<vmem>>, vector<4x384xbf16>,
    %c0_16 = arith.constant 0 : index
    %c0_17 = arith.constant 0 : index
    %c20 = arith.constant 20 : index
    %15 = vector.load %arg2[%c0_16, %c0_17, %c20] : memref<1x4x512xbf16, #tpu.memory_space<vmem>>, vector<1x4x384xbf16>
    %16 = vector.shape_cast %15 : vector<1x4x384xbf16> to vector<4x384xbf16>
    %c20_18 = arith.constant 20 : index
    %c0_19 = arith.constant 0 : index
    %17 = vector.load %arg7[%c20_18, %c0_19] : memref<36x384xbf16, #tpu.memory_space<vmem>>, vector<4x384xbf16>
    tpu.vector_store %arg7[%c20_18, %c0_19], %16 {strides = array<i32>} : memref<36x384xbf16, #tpu.memory_space<vmem>>, vector<4x384xbf16>,
    %c0_20 = arith.constant 0 : index
    %c0_21 = arith.constant 0 : index
    %c36 = arith.constant 36 : index
    %18 = vector.load %arg2[%c0_20, %c0_21, %c36] : memref<1x4x512xbf16, #tpu.memory_space<vmem>>, vector<1x4x384xbf16>
    %19 = vector.shape_cast %18 : vector<1x4x384xbf16> to vector<4x384xbf16>
    %c24 = arith.constant 24 : index
    %c0_22 = arith.constant 0 : index
    %20 = vector.load %arg7[%c24, %c0_22] : memref<36x384xbf16, #tpu.memory_space<vmem>>, vector<4x384xbf16>
    tpu.vector_store %arg7[%c24, %c0_22], %19 {strides = array<i32>} : memref<36x384xbf16, #tpu.memory_space<vmem>>, vector<4x384xbf16>,
    %c0_23 = arith.constant 0 : index
    %c0_24 = arith.constant 0 : index
    %c37 = arith.constant 37 : index
    %21 = vector.load %arg2[%c0_23, %c0_24, %c37] : memref<1x4x512xbf16, #tpu.memory_space<vmem>>, vector<1x4x384xbf16>
    %22 = vector.shape_cast %21 : vector<1x4x384xbf16> to vector<4x384xbf16>
    %c28 = arith.constant 28 : index
    %c0_25 = arith.constant 0 : index
    %23 = vector.load %arg7[%c28, %c0_25] : memref<36x384xbf16, #tpu.memory_space<vmem>>, vector<4x384xbf16>
    tpu.vector_store %arg7[%c28, %c0_25], %22 {strides = array<i32>} : memref<36x384xbf16, #tpu.memory_space<vmem>>, vector<4x384xbf16>,
    %c0_26 = arith.constant 0 : index
    %c0_27 = arith.constant 0 : index
    %c38 = arith.constant 38 : index
    %24 = vector.load %arg2[%c0_26, %c0_27, %c38] : memref<1x4x512xbf16, #tpu.memory_space<vmem>>, vector<1x4x384xbf16>
    %25 = vector.shape_cast %24 : vector<1x4x384xbf16> to vector<4x384xbf16>
    %c32 = arith.constant 32 : index
    %c0_28 = arith.constant 0 : index
    %26 = vector.load %arg7[%c32, %c0_28] : memref<36x384xbf16, #tpu.memory_space<vmem>>, vector<4x384xbf16>
    tpu.vector_store %arg7[%c32, %c0_28], %25 {strides = array<i32>} : memref<36x384xbf16, #tpu.memory_space<vmem>>, vector<4x384xbf16>,
    %c0_29 = arith.constant 0 : index
    %c0_30 = arith.constant 0 : index
    %27 = vector.load %arg7[%c0_29, %c0_30] : memref<36x384xbf16, #tpu.memory_space<vmem>>, vector<36x384xbf16>
    %c0_31 = arith.constant 0 : index
    %c0_32 = arith.constant 0 : index
    %28 = vector.load %arg3[%c0_31, %c0_32] : memref<24x36xbf16, #tpu.memory_space<vmem>>, vector<24x36xbf16>
    %cst = arith.constant dense<0.000000e+00> : vector<24x384xf32>
    %29 = tpu.matmul %28, %27, %cst {dimension_numbers = #tpu.dot_dimension_numbers<[1], [0], [0], [1], [0, 0, 1, 1], [], []>} : vector<24x36xbf16>, vector<36x384xbf16>, vector<24x384xf32> -> vector<24x384xf32>
    %c0_33 = arith.constant 0 : index
    %c0_34 = arith.constant 0 : index
    %30 = vector.load %arg4[%c0_33, %c0_34] : memref<1x384xf32, #tpu.memory_space<vmem>>, vector<1x384xf32>
    %31 = vector.broadcast %30 : vector<1x384xf32> to vector<24x384xf32>
    %32 = arith.mulf %29, %31 : vector<24x384xf32>
    %c0_i32 = arith.constant 0 : i32
    %33 = arith.cmpi eq, %arg1, %c0_i32 : i32
    %34 = arith.extui %33 : i1 to i32
    %c0_i32_35 = arith.constant 0 : i32
    %35 = arith.cmpi ne, %34, %c0_i32_35 : i32
    scf.if %35 {
      %cst_50 = arith.constant 0.000000e+00 : f32
      %49 = vector.broadcast %cst_50 : f32 to vector<1x24x1xf32>
      %c0_51 = arith.constant 0 : index
      %c0_52 = arith.constant 0 : index
      %c0_53 = arith.constant 0 : index
      %50 = vector.load %arg5[%c0_51, %c0_52, %c0_53] : memref<1x24x1xf32, #tpu.memory_space<vmem>>, vector<1x24x1xf32>
      tpu.vector_store %arg5[%c0_51, %c0_52, %c0_53], %49 {strides = array<i32>} : memref<1x24x1xf32, #tpu.memory_space<vmem>>, vector<1x24x1xf32>,
      %cst_54 = arith.constant 0.000000e+00 : f32
      %51 = vector.broadcast %cst_54 : f32 to vector<1x24x1xf32>
      %c0_55 = arith.constant 0 : index
      %c0_56 = arith.constant 0 : index
      %c0_57 = arith.constant 0 : index
      %52 = vector.load %arg6[%c0_55, %c0_56, %c0_57] : memref<1x24x1xf32, #tpu.memory_space<vmem>>, vector<1x24x1xf32>
      tpu.vector_store %arg6[%c0_55, %c0_56, %c0_57], %51 {strides = array<i32>} : memref<1x24x1xf32, #tpu.memory_space<vmem>>, vector<1x24x1xf32>,
    } else {
    }
    %c0_36 = arith.constant 0 : index
    %c0_37 = arith.constant 0 : index
    %c0_38 = arith.constant 0 : index
    %36 = vector.load %arg5[%c0_36, %c0_37, %c0_38] : memref<1x24x1xf32, #tpu.memory_space<vmem>>, vector<1x24x1xf32>
    %cst_39 = arith.constant dense<0.000000e+00> : vector<24xf32>
    %37 = vector.multi_reduction <add>, %32, %cst_39 [1] : vector<24x384xf32> to vector<24xf32>
    %38 = vector.shape_cast %37 : vector<24xf32> to vector<24x1xf32>
    %39 = vector.shape_cast %38 : vector<24x1xf32> to vector<1x24x1xf32>
    %40 = arith.addf %36, %39 : vector<1x24x1xf32>
    %c0_40 = arith.constant 0 : index
    %c0_41 = arith.constant 0 : index
    %c0_42 = arith.constant 0 : index
    %41 = vector.load %arg5[%c0_40, %c0_41, %c0_42] : memref<1x24x1xf32, #tpu.memory_space<vmem>>, vector<1x24x1xf32>
    tpu.vector_store %arg5[%c0_40, %c0_41, %c0_42], %40 {strides = array<i32>} : memref<1x24x1xf32, #tpu.memory_space<vmem>>, vector<1x24x1xf32>,
    %c0_43 = arith.constant 0 : index
    %c0_44 = arith.constant 0 : index
    %c0_45 = arith.constant 0 : index
    %42 = vector.load %arg6[%c0_43, %c0_44, %c0_45] : memref<1x24x1xf32, #tpu.memory_space<vmem>>, vector<1x24x1xf32>
    %43 = arith.mulf %32, %29 : vector<24x384xf32>
    %cst_46 = arith.constant dense<0.000000e+00> : vector<24xf32>
    %44 = vector.multi_reduction <add>, %43, %cst_46 [1] : vector<24x384xf32> to vector<24xf32>
    %45 = vector.shape_cast %44 : vector<24xf32> to vector<24x1xf32>
    %46 = vector.shape_cast %45 : vector<24x1xf32> to vector<1x24x1xf32>
    %47 = arith.addf %42, %46 : vector<1x24x1xf32>
    %c0_47 = arith.constant 0 : index
    %c0_48 = arith.constant 0 : index
    %c0_49 = arith.constant 0 : index
    %48 = vector.load %arg6[%c0_47, %c0_48, %c0_49] : memref<1x24x1xf32, #tpu.memory_space<vmem>>, vector<1x24x1xf32>
    tpu.vector_store %arg6[%c0_47, %c0_48, %c0_49], %47 {strides = array<i32>} : memref<1x24x1xf32, #tpu.memory_space<vmem>>, vector<1x24x1xf32>,
    return
  }
  func.func @transform_0(%arg0: i32, %arg1: i32) -> (i32, i32, i32) {
    %c1_i32 = arith.constant 1 : i32
    %0 = arith.muli %arg0, %c1_i32 : i32
    %1 = arith.addi %0, %arg1 : i32
    %c0_i32 = arith.constant 0 : i32
    %c0_i32_0 = arith.constant 0 : i32
    %c0_i32_1 = arith.constant 0 : i32
    return %1, %c0_i32, %c0_i32_0 : i32, i32, i32
  }
  func.func @transform_1(%arg0: i32, %arg1: i32) -> (i32, i32) {
    %c0_i32 = arith.constant 0 : i32
    %c0_i32_0 = arith.constant 0 : i32
    %c0_i32_1 = arith.constant 0 : i32
    return %c0_i32, %c0_i32_0 : i32, i32
  }
  func.func @transform_2(%arg0: i32, %arg1: i32) -> (i32, i32) {
    %c0_i32 = arith.constant 0 : i32
    %c0_i32_0 = arith.constant 0 : i32
    %c0_i32_1 = arith.constant 0 : i32
    return %c0_i32, %c0_i32_0 : i32, i32
  }
  func.func @transform_3(%arg0: i32, %arg1: i32) -> (i32, i32, i32) {
    %c0_i32 = arith.constant 0 : i32
    %c0_i32_0 = arith.constant 0 : i32
    %c0_i32_1 = arith.constant 0 : i32
    return %arg0, %c0_i32, %c0_i32_0 : i32, i32, i32
  }
  func.func @transform_4(%arg0: i32, %arg1: i32) -> (i32, i32, i32) {
    %c0_i32 = arith.constant 0 : i32
    %c0_i32_0 = arith.constant 0 : i32
    %c0_i32_1 = arith.constant 0 : i32
    return %arg0, %c0_i32, %c0_i32_0 : i32, i32, i32
  }
}

</mosaic_0001>

<bundles_post_ra>
// kernel: repvgg_block_forward.2
= control target key start
LH: loop header
LB: loop body
LE: loop exit
PB: predicated region body
PF: predicated region fallthrough
CT: control target
= control target key end

     0   :  { %s1021_s15 = smov 0   ;;  %s1023_s16 = smov 0   ;;  %s1123_s0 = inlined_call_operand.vmem [shape: bf16[2,4,512], index: 0, kind: input, shape index: {}]   ;;  %s1124_s1 = inlined_call_operand.vmem [shape: bf16[24,36], index: 1, kind: input, shape index: {}]   ;;  %s1125_s2 = inlined_call_operand.vmem [shape: f32[1,384], index: 2, kind: input, shape index: {}]   ;;  %s1126_s3 = inlined_call_operand.vmem [shape: f32[2,24,1], index: 3, kind: output, shape index: {0}]   ;;  %s1127_s4 = inlined_call_operand.vmem [shape: f32[2,24,1], index: 4, kind: output, shape index: {1}]  }
   0x1   :  { %s1025_s17 = smov 0  }
   0x2 LB: > { %s27_s18 = sadd.s32 1, %s979_s16  ;;  %p867_p0 = scmp.ge.s32.totalorder %s983_s17, 1  ;;  %s983_s17 = sphi %s1025_s17, %s15_s17   ;;  %s979_s16 = sphi %s1023_s16, %s1129_s16   ;;  %s975_s15 = sphi %s1021_s15, %s1128_s15  }
   0x3   : > { %p29_p1 = scmp.ge.s32.totalorder %s27_s18, 2  ;;  %p181_p2 = scmp.lt.s32.totalorder %s983_s17, 3 }
   0x5   : > { %s1131_s18 = smov (%p29_p1, %s27_s18), 0  ;;  %p182_p3 = pnand %p867_p0, %p181_p2 }
   0x6   : > { %p214_p4 = scmp.lt.s32.totalorder (!%p182_p3), %s975_s15, 1  ;;  %v258_v0 = vlaneseq (!%p182_p3)  ;;  %v985_v1 = vmov (!%p182_p3), 1983009808   ;;  %s986_s23 = smov (!%p182_p3), 126   ;;  %v1051_v14 = vld [vmem:[%s1124_s1] sm:$0xff] (!%p182_p3)   ;;  %vm562_vm0 = vcmask (!%p182_p3), 293888  }
   0x7   : > { %185 = sbr.rel (%p182_p3) target bundleno = 557 (0x22d), region = 32  ;;  %v256_v2 = vunpack.c.l.s4 (!%p182_p3), %v985_v1  ;;  %s987_s24 = smov (!%p182_p3), 127   ;;  %904 = vmatprep.mubr.msk.bf16.mxu1 (!%p182_p3), %vm562_vm0, %v1051_v14  ;;  %v994_v15 = vmov (!%p182_p3), 0   ;;  %vm277_vm1 = vcmask (!%p182_p3), 1039360   ;;  %vm339_vm2 = vcmask (!%p182_p3), 900096  }
   0x8   : > { %v1041_v3 = vshrl.u32 (!%p182_p3), %v258_v0, 7  ;;  %s988_s25 = smov (!%p182_p3), 110   ;;  %s989_s26 = smov (!%p182_p3), 109   ;;  %611 = vmatprep.mubr.bf16.mxu0 (!%p182_p3), %v994_v15  ;;  %vm275_vm3 = vcmask (!%p182_p3), 1043456   ;;  %vm308_vm4 = vcmask (!%p182_p3), 1031168   ;;  %vm370_vm5 = vcmask (!%p182_p3), 891904  }
   0x9   : > { %v257_v4 = vunpack.c.0.s8 (!%p182_p3), %v256_v2  ;;  %s990_s27 = smov (!%p182_p3), 108   ;;  %s991_s28 = smov (!%p182_p3), 92   ;;  %vm401_vm6 = vcmask (!%p182_p3), 883712   ;;  %vm432_vm7 = vcmask (!%p182_p3), 752640   ;;  %vm463_vm8 = vcmask (!%p182_p3), 744448  }
   0xa   : > { %s992_s29 = smov (!%p182_p3), 91   ;;  %s993_s30 = smov (!%p182_p3), 90   ;;  %vm494_vm9 = vcmask (!%p182_p3), 736256   ;;  %vm569_vm10 = vcmask (!%p182_p3), 1041408   ;;  %vm708_vm11 = vcmask (!%p182_p3), 7168  }
   0xb   : > { %v260_v5 = vsub.s32 (!%p182_p3), %v257_v4, %v1041_v3 }
   0xe   : > { %s1133_s15 = smov (!%p214_p4, %s975_s15), 1 }
   0xf   : > { %s892_s19 = sshll.u32 %s1133_s15, 3  ;;  %s909_s9 = smul.u32 24, %s1133_s15 }
  0x10   : > { %s218_s22 = scalar_lea.vmem %s1123_s0, %s892_s19 }
  0x11   : > { %v284_v6 = vld [vmem:[%s218_s22] sm:$0xff]  ;;  %s1080_s12 = scalar_lea.vmem %s1126_s3, %s909_s9  ;;  %s229_s21 = scalar_lea.vmem %s1127_s4, %s909_s9 }
  0x12   : > { %v231_v7 = vld [vmem:[%s218_s22] sm:$0x3f]  ;;  %v293_v8 = vrot.slane %v284_v6, %v260_v5  ;;  %v254_v9 = vcombine.low %v284_v6, %v284_v6  ;;  %v286_v11 = vcombine.high %v284_v6, %v284_v6 }
  0x13   : > { %v233_v10 = vcombine.high %v231_v7, %v231_v7  ;;  %872 = vst.sshfl [vmem:[#allocation2] sm:$0xf pattern:$0x76325410] %v231_v7 }
  0x14   : > { %301 = vrot.lane.b32.xlu1 %v293_v8, %s986_s23  ;;  %271 = vrot.lane.b32.xlu0 %v293_v8, %s987_s24  ;;  %v261_v12 = vrot.slane %v254_v9, %v260_v5  ;;  %v300_v13 = vrot.slane %v286_v11, %v260_v5 }
  0x15   : > { %873 = vst.sshfl [vmem:[#allocation2 + $0x8] sm:$0x3 pattern:$0x76325410] %v233_v10 }
  0x18   : > { %334 = vrot.lane.b32.xlu1 %v293_v8, %s988_s25  ;;  %269 = vrot.lane.b32.xlu0 %v261_v12, %s987_s24 }
  0x1c   : > { %303 = vrot.lane.b32.xlu1 %v300_v13, %s986_s23  ;;  %332 = vrot.lane.b32.xlu0 %v261_v12, %s988_s25 }
  0x20   : > { %365 = vrot.lane.b32.xlu1 %v300_v13, %s989_s26  ;;  %363 = vrot.lane.b32.xlu0 %v293_v8, %s989_s26 }
  0x24   : > { %396 = vrot.lane.b32.xlu1 %v293_v8, %s990_s27  ;;  %394 = vrot.lane.b32.xlu0 %v261_v12, %s990_s27 }
  0x28   : > { %427 = vrot.lane.b32.xlu1 %v300_v13, %s991_s28  ;;  %425 = vrot.lane.b32.xlu0 %v293_v8, %s991_s28 }
  0x2c   : > { %458 = vrot.lane.b32.xlu1 %v293_v8, %s992_s29  ;;  %456 = vrot.lane.b32.xlu0 %v261_v12, %s992_s29 }
  0x30   : > { %489 = vrot.lane.b32.xlu1 %v300_v13, %s993_s30  ;;  %487 = vrot.lane.b32.xlu0 %v293_v8, %s993_s30 }
  0x86   : > { %v302_v16 = vpop.permute.xlu1 %301  ;;  %v272_v17 = vpop.permute.xlu0 %271 }
  0x87   : > { %v274_v18 = vrot.slane %v272_v17, 4  ;;  %v305_v29 = vrot.slane %v302_v16, 4 }
  0x89   : > { %v279_v19 = vsel %vm277_vm1, %v272_v17, %v274_v18 }
  0x8a   : > { %283 = vst [vmem:[#allocation2 + $0x8] sm:$0xc] %v279_v19  ;;  %v335_v20 = vpop.permute.xlu1 %334  ;;  %v270_v21 = vpop.permute.xlu0 %269 }
  0x8b   : > { %v337_v22 = vrot.slane %v335_v20, 4  ;;  %v273_v23 = vrot.slane %v270_v21, 4 }
  0x8d   : > { %v341_v24 = vsel %vm339_vm2, %v335_v20, %v337_v22  ;;  %v276_v25 = vsel %vm275_vm3, %v273_v23, %v274_v18 }
  0x8e   : > { %345 = vst [vmem:[#allocation2 + $0x14] sm:$0xc] %v341_v24  ;;  %v278_v26 = vsel %vm277_vm1, %v270_v21, %v276_v25  ;;  %v304_v27 = vpop.permute.xlu1 %303  ;;  %v333_v28 = vpop.permute.xlu0 %332  ;;  %v995_v24 = vmov 0.0   ;;  %v678_v25 = vld [vmem:[%s1125_s2] sm:$0x7] }
  0x8f   : > { %282 = vst [vmem:[#allocation2] sm:$0xcc] %v278_v26  ;;  %v306_v30 = vrot.slane %v304_v27, 4  ;;  %v336_v31 = vrot.slane %v333_v28, 4  ;;  %709 = vst.msk [vmem:[%s1080_s12] sm:$0xff] %vm708_vm11, %v995_v24  ;;  %v686_v26 = vsub.s32 1, %v1041_v3 }
  0x90   : > { %710 = vst.msk [vmem:[%s1080_s12 + $0x8] sm:$0xff] %vm708_vm11, %v995_v24  ;;  %711 = vst.msk [vmem:[%s1080_s12 + $0x10] sm:$0xff] %vm708_vm11, %v995_v24 }
  0x91   : > { %v307_v32 = vsel %vm275_vm3, %v305_v29, %v306_v30  ;;  %v310_v33 = vsel %vm308_vm4, %v304_v27, %v306_v30  ;;  %v338_v34 = vsel %vm275_vm3, %v336_v31, %v337_v22  ;;  %v960_v22 = vld [vmem:[%s1124_s1 + $0x8] ss:$0 sps:$4 sm:$0xff]   ;;  %v687_v30 = vrot.slane %v678_v25, %v686_v26  ;;  %712 = vst.msk [vmem:[%s229_s21] sm:$0xff] %vm708_vm11, %v995_v24 }
  0x92   : > { %v309_v35 = vsel %vm308_vm4, %v302_v16, %v307_v32  ;;  %314 = vst [vmem:[#allocation2 + $0x14] sm:$0x3] %v310_v33  ;;  %v340_v36 = vsel %vm339_vm2, %v333_v28, %v338_v34  ;;  %v366_v37 = vpop.permute.xlu1 %365  ;;  %v364_v38 = vpop.permute.xlu0 %363  ;;  %713 = vst.msk [vmem:[%s229_s21 + $0x8] sm:$0xff] %vm708_vm11, %v995_v24 }
  0x93   : > { %313 = vst [vmem:[#allocation2 + $0xc] sm:$0x33] %v309_v35  ;;  %344 = vst [vmem:[#allocation2 + $0xc] sm:$0xcc] %v340_v36  ;;  %v368_v39 = vrot.slane %v366_v37, 4  ;;  %v367_v40 = vrot.slane %v364_v38, 4 }
  0x94   : > { %714 = vst.msk [vmem:[%s229_s21 + $0x10] sm:$0xff] %vm708_vm11, %v995_v24 }
  0x95   : > { %v372_v41 = vsel %vm370_vm5, %v366_v37, %v368_v39  ;;  %v369_v42 = vsel %vm275_vm3, %v367_v40, %v368_v39 }
  0x96   : > { %376 = vst [vmem:[#allocation2 + $0x20] sm:$0x3] %v372_v41  ;;  %v371_v43 = vsel %vm370_vm5, %v364_v38, %v369_v42  ;;  %v397_v44 = vpop.permute.xlu1 %396  ;;  %v395_v45 = vpop.permute.xlu0 %394 }
  0x97   : > { %375 = vst [vmem:[#allocation2 + $0x18] sm:$0x33] %v371_v43  ;;  %v399_v46 = vrot.slane %v397_v44, 4  ;;  %v398_v47 = vrot.slane %v395_v45, 4 }
  0x99   : > { %v403_v48 = vsel %vm401_vm6, %v397_v44, %v399_v46  ;;  %v400_v49 = vsel %vm275_vm3, %v398_v47, %v399_v46  ;;  %v948_v50 = vld [vmem:[#allocation2 + $0x8] ss:$12 sps:$4 sm:$0xff]  }
  0x9a   : > { %407 = vst [vmem:[#allocation2 + $0x20] sm:$0xc] %v403_v48  ;;  %v402_v51 = vsel %vm401_vm6, %v395_v45, %v400_v49  ;;  %v428_v52 = vpop.permute.xlu1 %427  ;;  %v426_v53 = vpop.permute.xlu0 %425  ;;  %v949_v54 = vld [vmem:[#allocation2 + $0x4] ss:$12 sps:$4 sm:$0xff]   ;;  %v951_v55 = vld [vmem:[#allocation2] ss:$12 sps:$4 sm:$0xff]   ;;  %898 = vmatprep.subr.bf16.mxu1 %v948_v50 }
  0x9b   : > { %406 = vst [vmem:[#allocation2 + $0x18] sm:$0xcc] %v402_v51  ;;  %v430_v56 = vrot.slane %v428_v52, 4  ;;  %v429_v57 = vrot.slane %v426_v53, 4  ;;  %579 = vmatprep.subr.bf16.mxu0 %v949_v54  ;;  %899 = vmatpush3.bf16.msra.mxu1 %v948_v50 }
  0x9c   : > { %580 = vmatpush1.bf16.msra.mxu0 %v951_v55 }
  0x9d   : > { %v434_v58 = vsel %vm432_vm7, %v428_v52, %v430_v56  ;;  %v431_v59 = vsel %vm275_vm3, %v429_v57, %v430_v56 }
  0x9e   : > { %438 = vst [vmem:[#allocation2 + $0x2c] sm:$0x3] %v434_v58  ;;  %v433_v60 = vsel %vm432_vm7, %v426_v53, %v431_v59  ;;  %v459_v61 = vpop.permute.xlu1 %458  ;;  %v457_v62 = vpop.permute.xlu0 %456 }
  0x9f   : > { %437 = vst [vmem:[#allocation2 + $0x24] sm:$0x33] %v433_v60  ;;  %v461_v63 = vrot.slane %v459_v61, 4  ;;  %v460_v0 = vrot.slane %v457_v62, 4 }
  0xa1   : > { %v465_v1 = vsel %vm463_vm8, %v459_v61, %v461_v63  ;;  %v462_v2 = vsel %vm275_vm3, %v460_v0, %v461_v63 }
  0xa2   : > { %469 = vst [vmem:[#allocation2 + $0x2c] sm:$0xc] %v465_v1  ;;  %v464_v4 = vsel %vm463_vm8, %v457_v62, %v462_v2  ;;  %v490_v5 = vpop.permute.xlu1 %489  ;;  %v488_v6 = vpop.permute.xlu0 %487 }
  0xa3   : > { %468 = vst [vmem:[#allocation2 + $0x24] sm:$0xcc] %v464_v4  ;;  %v492_v7 = vrot.slane %v490_v5, 4  ;;  %v491_v8 = vrot.slane %v488_v6, 4 }
  0xa5   : > { %v496_v9 = vsel %vm494_vm9, %v490_v5, %v492_v7  ;;  %v493_v10 = vsel %vm275_vm3, %v491_v8, %v492_v7  ;;  %v715_v8 = vld [vmem:[%s1080_s12] sm:$0xff] }
  0xa6   : > { %500 = vst [vmem:[#allocation2 + $0x38] sm:$0x3] %v496_v9  ;;  %v495_v11 = vsel %vm494_vm9, %v488_v6, %v493_v10  ;;  %v716_v10 = vld [vmem:[%s1080_s12 + $0x8] sm:$0xff] }
  0xa7   : > { %499 = vst [vmem:[#allocation2 + $0x30] sm:$0x33] %v495_v11 }
  0xa9   : > { %v952_v12 = vld [vmem:[#allocation2 + $0x20] ss:$12 sps:$4 sm:$0xff]  }
  0xaa   : > { %v953_v13 = vld [vmem:[#allocation2 + $0x1c] ss:$12 sps:$4 sm:$0xff]   ;;  %v955_v16 = vld [vmem:[#allocation2 + $0x18] ss:$12 sps:$4 sm:$0xff]   ;;  %900 = vmatprep.subr.bf16.mxu1 %v952_v12 }
  0xab   : > { %581 = vmatprep.subr.bf16.mxu0 %v953_v13  ;;  %901 = vmatpush3.bf16.msra.mxu1 %v952_v12  ;;  %v737_v13 = vld [vmem:[%s229_s21] sm:$0xff] }
  0xac   : > { %582 = vmatpush1.bf16.msra.mxu0 %v955_v16 }
  0xad   : > { %v956_v17 = vld [vmem:[#allocation2 + $0x38] ss:$0 sps:$4 sm:$0x33]  }
  0xae   : > { %v509_v18 = vld [vmem:[#allocation2 + $0x30] sm:$0x33]  ;;  %908 = vmatprep.subr.msk.bf16.mxu1 %vm569_vm10, %v956_v17  ;;  %v577_v20 = vsel %vm569_vm10, %v956_v17, 0 }
  0xaf   : > { %v883_v19 = vcombine.high %v509_v18, %v509_v18  ;;  %v882_v21 = vcombine.low %v509_v18, %v509_v18  ;;  %903 = vmatpush3.bf16.msra.mxu1 %v577_v20  ;;  %v738_v18 = vld [vmem:[%s229_s21 + $0x8] sm:$0xff] }
  0xb1   : > { %885 = vmatprep.subr.msk.bf16.mxu0 %vm569_vm10, %v883_v19  ;;  %v571_v23 = vsel %vm569_vm10, %v882_v21, 0  ;;  %v717_v21 = vld [vmem:[%s1080_s12 + $0x10] sm:$0xff] }
  0xb2   : > { %584 = vmatpush1.bf16.msra.mxu0 %v571_v23  ;;  %905 = vmatmul.mubr.msk.bf16.vlgmr.msra.gmra.mrb[0].mxu1 %vm562_vm0, %v960_v22 }
  0xb5   : > { %886 = vmatmul.mubr.msk.bf16.vlgmr.msra.gmra.mrb[0].mxu0 %vm562_vm0, %v1051_v14  ;;  %v690_v14 = vsub.s32 2, %v1041_v3 }
  0xb6   : > { %621 = vmatprep.mubr.bf16.mxu0 %v994_v15  ;;  %v682_v15 = vsub.s32 0, %v1041_v3 }
  0xb7   : > { %v691_v27 = vrot.slane %v678_v25, %v690_v14  ;;  %v739_v14 = vld [vmem:[%s229_s21 + $0x10] sm:$0xff] }
  0xb8   : > { %v683_v28 = vrot.slane %v678_v25, %v682_v15 }
  0xbd   : > { %887 = vmatmul.mubr.msk.bf16.gmra.mrb[4].mxu0 %vm562_vm0, %v960_v22 }
 0x185   : > { %v906_v29 = vpop.f32.mrb[0].mxu1 }
 0x186   : > { %v664_v31 = vpop.f32.mrb[1].mxu1  ;;  %v703_v59 = vmul.f32 %v906_v29, %v691_v27 }
 0x187   : > { %v907_v33 = vpop.f32.mrb[2].mxu1  ;;  %v697_v35 = vmul.f32 %v691_v27, %v664_v31 }
 0x188   : > { %v613_v32 = vpop.f32.mrb[0].mxu0  ;;  %v667_v37 = vpop.f32.mrb[3].mxu1  ;;  %v748_v4 = vmul.f32 %v906_v29, %v703_v59 }
 0x189   : > { %v695_v34 = vmul.f32 %v683_v28, %v613_v32  ;;  %v615_v36 = vpop.f32.mrb[1].mxu0  ;;  %v700_v44 = vmul.f32 %v691_v27, %v667_v37  ;;  %v742_v46 = vmul.f32 %v697_v35, %v664_v31 }
 0x18a   : > { %v696_v38 = vmul.f32 %v687_v30, %v615_v36  ;;  %v617_v39 = vpop.f32.mrb[2].mxu0 }
 0x18b   : > { %v740_v40 = vmul.f32 %v695_v34, %v613_v32  ;;  %v698_v41 = vmul.f32 %v683_v28, %v617_v39  ;;  %v619_v42 = vpop.f32.mrb[3].mxu0  ;;  %v745_v52 = vmul.f32 %v700_v44, %v667_v37 }
 0x18c   : > { %v741_v43 = vmul.f32 %v696_v38, %v615_v36  ;;  %v699_v45 = vmul.f32 %v687_v30, %v619_v42  ;;  %v718_v3 = vadd.f32 %v696_v38, %v695_v34 }
 0x18d   : > { %v743_v47 = vmul.f32 %v698_v41, %v617_v39 }
 0x18e   : > { %v744_v48 = vmul.f32 %v699_v45, %v619_v42  ;;  %v719_v49 = vadd.f32 %v718_v3, %v697_v35  ;;  %v722_v50 = vadd.f32 %v699_v45, %v698_v41  ;;  %v749_v51 = vadd.f32 %v741_v43, %v740_v40 }
 0x190   : > { %v623_v53 = vpop.f32.mrb[4].mxu0  ;;  %720 = vadd.xlane.f32.xlu0 %v719_v49  ;;  %v723_v54 = vadd.f32 %v722_v50, %v700_v44  ;;  %v750_v55 = vadd.f32 %v749_v51, %v742_v46  ;;  %v753_v56 = vadd.f32 %v744_v48, %v743_v47 }
 0x191   : > { %v701_v57 = vmul.f32 %v683_v28, %v623_v53  ;;  %v625_v58 = vpop.f32.mrb[5].mxu0 }
 0x192   : > { %v702_v60 = vmul.f32 %v687_v30, %v625_v58  ;;  %v627_v61 = vpop.f32.mrb[6].mxu0  ;;  %724 = vadd.xlane.f32.xlu1 %v723_v54  ;;  %v754_v62 = vadd.f32 %v753_v56, %v745_v52 }
 0x193   : > { %v746_v63 = vmul.f32 %v701_v57, %v623_v53  ;;  %v628_v0 = vpop.f32.mrb[7].mxu0 }
 0x194   : > { %v747_v1 = vmul.f32 %v702_v60, %v625_v58  ;;  %751 = vadd.xlane.f32.xlu0 %v750_v55  ;;  %v726_v2 = vadd.f32 %v702_v60, %v701_v57 }
 0x196   : > { %755 = vadd.xlane.f32.xlu1 %v754_v62  ;;  %v727_v5 = vadd.f32 %v726_v2, %v703_v59  ;;  %v757_v6 = vadd.f32 %v747_v1, %v746_v63 }
 0x198   : > { %728 = vadd.xlane.f32.xlu0 %v727_v5  ;;  %v758_v7 = vadd.f32 %v757_v6, %v748_v4 }
 0x19c   : > { %759 = vadd.xlane.f32.xlu0 %v758_v7 }
 0x21d   : > { %v721_v9 = vpop.xlane.xlu0 %720 }
 0x21e   : > { %v730_v11 = vadd.f32 %v721_v9, %v715_v8 }
 0x21f   : > { %v725_v12 = vpop.xlane.xlu1 %724 }
 0x220   : > { %734 = vst.msk [vmem:[%s1080_s12] sm:$0xff] %vm708_vm11, %v730_v11  ;;  %v731_v16 = vadd.f32 %v725_v12, %v716_v10 }
 0x221   : > { %v752_v17 = vpop.xlane.xlu0 %751 }
 0x222   : > { %735 = vst.msk [vmem:[%s1080_s12 + $0x8] sm:$0xff] %vm708_vm11, %v731_v16  ;;  %v761_v19 = vadd.f32 %v752_v17, %v737_v13 }
 0x223   : > { %v756_v20 = vpop.xlane.xlu1 %755 }
 0x224   : > { %764 = vst.msk [vmem:[%s229_s21] sm:$0xff] %vm708_vm11, %v761_v19  ;;  %v762_v22 = vadd.f32 %v756_v20, %v738_v18 }
 0x225   : > { %v729_v23 = vpop.xlane.xlu0 %728 }
 0x226   : > { %765 = vst.msk [vmem:[%s229_s21 + $0x8] sm:$0xff] %vm708_vm11, %v762_v22  ;;  %v732_v24 = vadd.f32 %v729_v23, %v717_v21 }
 0x228   : > { %736 = vst.msk [vmem:[%s1080_s12 + $0x10] sm:$0xff] %vm708_vm11, %v732_v24 }
 0x229   : > { %v760_v15 = vpop.xlane.xlu0 %759 }
 0x22a   : > { %v763_v25 = vadd.f32 %v760_v15, %v739_v14 }
 0x22c   : > { %766 = vst.msk [vmem:[%s229_s21 + $0x10] sm:$0xff] %vm708_vm11, %v763_v25 }
 0x22d PF: > { %s15_s17 = sadd.s32 1, %s983_s17   ;;  %s1128_s15 = smov %s979_s16 }
 0x22e   : > { %p12_p5 = scmp.ge.s32.totalorder %s15_s17, 4   ;;  %s1129_s16 = smov %s1131_s18 }
 0x230   :  { %14 = sbr.rel (!%p12_p5) target bundleno = 2 (0x2), region = 78 }

// kernel: repvgg_block_forward.3
= control target key start
LH: loop header
LB: loop body
LE: loop exit
PB: predicated region body
PF: predicated region fallthrough
CT: control target
= control target key end

     0   :  { %8 = vsyncpa [#allocation4], 0  ;;  %s2922_s0 = inlined_call_operand.vmem [shape: bf16[2,4,512], index: 0, kind: input, shape index: {}]   ;;  %s2923_s1 = inlined_call_operand.vmem [shape: bf16[8,36], index: 1, kind: input, shape index: {}]   ;;  %s2924_s2 = inlined_call_operand.vmem [shape: f32[8,1], index: 2, kind: input, shape index: {}]   ;;  %s2925_s3 = inlined_call_operand.hbm [shape: f32[2,8,16,16], index: 3, kind: output, shape index: {}]  }
   0x1   :  { %10 = vsyncpa [#allocation4 + $0x1], 0  ;;  %s1929_s12 = smov 0   ;;  %s1931_s13 = smov 0  }
   0x2   :  { %s1933_s14 = smov 0   ;;  %s1935_s15 = smov 0  }
   0x3 LB: > { %s1950_s16 = sadd.s32 4294967295, %s1878_s15   ;;  %s1692_s17 = sadd.s32 4294967294, %s1878_s15   ;;  %s1878_s15 = sphi %s1935_s15, %s2936_s15   ;;  %s1874_s14 = sphi %s1933_s14, %s2935_s14   ;;  %s1870_s13 = sphi %s1931_s13, %s2934_s13   ;;  %s1866_s12 = sphi %s1929_s12, %s2933_s12  }
   0x4   : > { %s1954_s18 = sadd.s32 1, %s1878_s15   ;;  %s91_s19 = sadd.s32 1, %s1874_s14 }
   0x5   : > { %s88_s20 = ssub.s32 %s1878_s15, %s1954_s18  ;;  %p101_p0 = scmp.ne.s32.totalorder %s1874_s14, %s1870_s13 }
   0x6   : > { %p89_p1 = scmp.eq.s32.totalorder %s88_s20, 0  ;;  %p102_p2 = scmp.eq.s32.totalorder %s1950_s16, 1 }
   0x7   : > { %p107_p3 = scmp.ne.s32.totalorder %s1870_s13, %s1866_s12  ;;  %p108_p4 = scmp.eq.s32.totalorder %s1692_s17, 1 }
   0x8   : > { %s1965_s21 = scalar_select %p89_p1, %s1874_s14, %s91_s19  }
   0x9   : > { %p1967_p5 = por %p102_p2, %p101_p0  ;;  %p1971_p6 = por %p108_p4, %p107_p3 }
   0xa   : > { %p1695_p7 = scmp.ge.s32.totalorder %s1878_s15, 1  ;;  %p140_p8 = scmp.lt.s32.totalorder %s1878_s15, 3 }
   0xc   : > { %p141_p9 = pnand %p1695_p7, %p140_p8 }
   0xd   : > { %p164_p10 = scmp.lt.s32.totalorder (!%p141_p9), %s1950_s16, 1  ;;  %v197_v0 = vlaneseq (!%p141_p9)  ;;  %v1880_v1 = vmov (!%p141_p9), 1983009808   ;;  %s1881_s29 = smov (!%p141_p9), 126   ;;  %v1884_v14 = vmov (!%p141_p9), 0.0   ;;  %vm1890_vm0 = vmmov (!%p141_p9), 0  }
   0xe   : > { %144 = sbr.rel (%p141_p9) target bundleno = 814 (0x32e), region = 32  ;;  %v195_v2 = vunpack.c.l.s4 (!%p141_p9), %v1880_v1  ;;  %s1882_s30 = smov (!%p141_p9), 127   ;;  %1724 = vmatprep.subr.bf16.mxu1 (!%p141_p9), %v1884_v14  ;;  %1730 = vmatprep.mubr.msk.bf16.mxu1 (!%p141_p9), %vm1890_vm0, %v1884_v14  ;;  %v1891_v15 = vmov (!%p141_p9), 0   ;;  %v451_v16 = vld [vmem:[%s2924_s2] sm:$0xff] (!%p141_p9)  ;;  %vm216_vm1 = vcmask (!%p141_p9), 1039360   ;;  %vm278_vm2 = vcmask (!%p141_p9), 900096  }
   0xf   : > { %v1979_v3 = vshrl.u32 (!%p141_p9), %v197_v0, 7  ;;  %s1883_s4 = smov (!%p141_p9), 110   ;;  %s1885_s5 = smov (!%p141_p9), 109   ;;  %543 = vmatprep.mubr.bf16.mxu0 (!%p141_p9), %v1891_v15  ;;  %1801 = vset.pattern.permute.xlu0 (!%p141_p9), %v1891_v15  ;;  %vm214_vm3 = vcmask (!%p141_p9), 1043456   ;;  %vm247_vm4 = vcmask (!%p141_p9), 1031168   ;;  %vm309_vm5 = vcmask (!%p141_p9), 891904  }
  0x10   : > { %v196_v4 = vunpack.c.0.s8 (!%p141_p9), %v195_v2  ;;  %s1886_s6 = smov (!%p141_p9), 108   ;;  %s1887_s7 = smov (!%p141_p9), 92   ;;  %vm340_vm6 = vcmask (!%p141_p9), 883712   ;;  %vm371_vm7 = vcmask (!%p141_p9), 752640   ;;  %vm402_vm8 = vcmask (!%p141_p9), 744448  }
  0x11   : > { %s1888_s8 = smov (!%p141_p9), 91   ;;  %s1889_s9 = smov (!%p141_p9), 90   ;;  %vm433_vm9 = vcmask (!%p141_p9), 736256   ;;  %vm501_vm10 = vcmask (!%p141_p9), 1041408   ;;  %vm497_vm11 = vcmask (!%p141_p9), 293888   ;;  %vm653_vm12 = vcmask (!%p141_p9), 122880  }
  0x12   : > { %v199_v5 = vsub.s32 (!%p141_p9), %v196_v4, %v1979_v3  ;;  %s161_s20 = sand.u32 (!%p141_p9), 1, %s1870_s13   ;;  %s1893_s26 = smov (!%p141_p9), 114   ;;  %vm1033_vm13 = vcmask (!%p141_p9), 15360   ;;  %vm1478_vm14 = vcmask (!%p141_p9), 31744  }
  0x13   : > { %s1894_s27 = smov (!%p141_p9), 74   ;;  %s1902_s10 = smov (!%p141_p9), 58  }
  0x14   : > { %s1903_s11 = smov (!%p141_p9), 40   ;;  %s1904_s17 = smov (!%p141_p9), 22  }
  0x15   : > { %s165_s24 = scalar_select %p164_p10, %s1950_s16, 1 }
  0x16   : > { %s1905_s19 = smov 4  }
  0x17   : > { %s1718_s25 = sshll.u32 %s165_s24, 3  ;;  %s1696_s24 = sshll.u32 %s161_s20, 7 }
  0x18   : > { %s168_s28 = scalar_lea.vmem %s2922_s0, %s1718_s25  ;;  %s2039_s25 = scalar_lea.vmem [#allocation3], %s1696_s24 }
  0x19   : > { %v223_v6 = vld [vmem:[%s168_s28] sm:$0xff] }
  0x1a   : > { %v170_v7 = vld [vmem:[%s168_s28] sm:$0x3f]  ;;  %v232_v8 = vrot.slane %v223_v6, %v199_v5  ;;  %v193_v9 = vcombine.low %v223_v6, %v223_v6  ;;  %v225_v11 = vcombine.high %v223_v6, %v223_v6  ;;  %s1895_s28 = smov 56  }
  0x1b   : > { %v172_v10 = vcombine.high %v170_v7, %v170_v7  ;;  %1699 = vst.sshfl [vmem:[#allocation2] sm:$0xf pattern:$0x76325410] %v170_v7 }
  0x1c   : > { %240 = vrot.lane.b32.xlu1 %v232_v8, %s1881_s29  ;;  %210 = vrot.lane.b32.xlu0 %v232_v8, %s1882_s30  ;;  %v200_v12 = vrot.slane %v193_v9, %v199_v5  ;;  %v239_v13 = vrot.slane %v225_v11, %v199_v5 }
  0x1d   : > { %1700 = vst.sshfl [vmem:[#allocation2 + $0x8] sm:$0x3 pattern:$0x76325410] %v172_v10 }
  0x20   : > { %273 = vrot.lane.b32.xlu1 %v232_v8, %s1883_s4  ;;  %208 = vrot.lane.b32.xlu0 %v200_v12, %s1882_s30  ;;  %s1897_s30 = smov 20  }
  0x24   : > { %242 = vrot.lane.b32.xlu1 %v239_v13, %s1881_s29  ;;  %271 = vrot.lane.b32.xlu0 %v200_v12, %s1883_s4  ;;  %s1896_s29 = smov 38  }
  0x28   : > { %304 = vrot.lane.b32.xlu1 %v239_v13, %s1885_s5  ;;  %302 = vrot.lane.b32.xlu0 %v232_v8, %s1885_s5  ;;  %s1898_s5 = smov 112  }
  0x2c   : > { %335 = vrot.lane.b32.xlu1 %v232_v8, %s1886_s6  ;;  %333 = vrot.lane.b32.xlu0 %v200_v12, %s1886_s6  ;;  %s1899_s6 = smov 94  }
  0x30   : > { %366 = vrot.lane.b32.xlu1 %v239_v13, %s1887_s7  ;;  %364 = vrot.lane.b32.xlu0 %v232_v8, %s1887_s7 }
  0x34   : > { %397 = vrot.lane.b32.xlu1 %v232_v8, %s1888_s8  ;;  %395 = vrot.lane.b32.xlu0 %v200_v12, %s1888_s8  ;;  %s1900_s8 = smov 76  }
  0x38   : > { %428 = vrot.lane.b32.xlu1 %v239_v13, %s1889_s9  ;;  %426 = vrot.lane.b32.xlu0 %v232_v8, %s1889_s9  ;;  %s1901_s9 = smov 2  }
  0x3c   : > { %454 = vperm.xlu0 %1801, %v451_v16  }
  0x8e   : > { %v241_v17 = vpop.permute.xlu1 %240  ;;  %v211_v18 = vpop.permute.xlu0 %210 }
  0x8f   : > { %v213_v19 = vrot.slane %v211_v18, 4  ;;  %v244_v30 = vrot.slane %v241_v17, 4 }
  0x91   : > { %v218_v20 = vsel %vm216_vm1, %v211_v18, %v213_v19 }
  0x92   : > { %222 = vst [vmem:[#allocation2 + $0x8] sm:$0xc] %v218_v20  ;;  %v274_v21 = vpop.permute.xlu1 %273  ;;  %v209_v22 = vpop.permute.xlu0 %208 }
  0x93   : > { %v276_v23 = vrot.slane %v274_v21, 4  ;;  %v212_v24 = vrot.slane %v209_v22, 4 }
  0x95   : > { %v280_v25 = vsel %vm278_vm2, %v274_v21, %v276_v23  ;;  %v215_v26 = vsel %vm214_vm3, %v212_v24, %v213_v19 }
  0x96   : > { %284 = vst [vmem:[#allocation2 + $0x14] sm:$0xc] %v280_v25  ;;  %v217_v27 = vsel %vm216_vm1, %v209_v22, %v215_v26  ;;  %v243_v28 = vpop.permute.xlu1 %242  ;;  %v272_v29 = vpop.permute.xlu0 %271  ;;  %v450_v22 = vld [vmem:[%s2923_s1] sm:$0xf] }
  0x97   : > { %221 = vst [vmem:[#allocation2] sm:$0xcc] %v217_v27  ;;  %v245_v31 = vrot.slane %v243_v28, 4  ;;  %v275_v32 = vrot.slane %v272_v29, 4 }
  0x99   : > { %v246_v33 = vsel %vm214_vm3, %v244_v30, %v245_v31  ;;  %v249_v34 = vsel %vm247_vm4, %v243_v28, %v245_v31  ;;  %v277_v35 = vsel %vm214_vm3, %v275_v32, %v276_v23 }
  0x9a   : > { %v248_v36 = vsel %vm247_vm4, %v241_v17, %v246_v33  ;;  %253 = vst [vmem:[#allocation2 + $0x14] sm:$0x3] %v249_v34  ;;  %v279_v37 = vsel %vm278_vm2, %v272_v29, %v277_v35  ;;  %v305_v38 = vpop.permute.xlu1 %304  ;;  %v303_v39 = vpop.permute.xlu0 %302 }
  0x9b   : > { %252 = vst [vmem:[#allocation2 + $0xc] sm:$0x33] %v248_v36  ;;  %283 = vst [vmem:[#allocation2 + $0xc] sm:$0xcc] %v279_v37  ;;  %v307_v40 = vrot.slane %v305_v38, 4  ;;  %v306_v41 = vrot.slane %v303_v39, 4 }
  0x9d   : > { %v311_v42 = vsel %vm309_vm5, %v305_v38, %v307_v40  ;;  %v308_v43 = vsel %vm214_vm3, %v306_v41, %v307_v40 }
  0x9e   : > { %315 = vst [vmem:[#allocation2 + $0x20] sm:$0x3] %v311_v42  ;;  %v310_v44 = vsel %vm309_vm5, %v303_v39, %v308_v43  ;;  %v336_v45 = vpop.permute.xlu1 %335  ;;  %v334_v46 = vpop.permute.xlu0 %333  ;;  %v2016_v39 = vsub.s32 0, %v1979_v3 }
  0x9f   : > { %314 = vst [vmem:[#allocation2 + $0x18] sm:$0x33] %v310_v44  ;;  %v338_v47 = vrot.slane %v336_v45, 4  ;;  %v337_v48 = vrot.slane %v334_v46, 4 }
  0xa1   : > { %v342_v49 = vsel %vm340_vm6, %v336_v45, %v338_v47  ;;  %v339_v50 = vsel %vm214_vm3, %v337_v48, %v338_v47  ;;  %v1805_v51 = vld [vmem:[#allocation2 + $0x8] ss:$12 sps:$4 sm:$0xff]  }
  0xa2   : > { %346 = vst [vmem:[#allocation2 + $0x20] sm:$0xc] %v342_v49  ;;  %v341_v52 = vsel %vm340_vm6, %v334_v46, %v339_v50  ;;  %v367_v53 = vpop.permute.xlu1 %366  ;;  %v365_v54 = vpop.permute.xlu0 %364  ;;  %v1806_v55 = vld [vmem:[#allocation2 + $0x4] ss:$12 sps:$4 sm:$0xff]   ;;  %v1808_v56 = vld [vmem:[#allocation2] ss:$12 sps:$4 sm:$0xff]   ;;  %1725 = vmatpush3.bf16.msra.mxu1 %v1805_v51 }
  0xa3   : > { %345 = vst [vmem:[#allocation2 + $0x18] sm:$0xcc] %v341_v52  ;;  %v369_v57 = vrot.slane %v367_v53, 4  ;;  %v368_v58 = vrot.slane %v365_v54, 4  ;;  %511 = vmatprep.subr.bf16.mxu0 %v1806_v55  ;;  %1726 = vmatprep.subr.bf16.mxu1 %v1884_v14 }
  0xa4   : > { %512 = vmatpush1.bf16.msra.mxu0 %v1808_v56 }
  0xa5   : > { %v373_v59 = vsel %vm371_vm7, %v367_v53, %v369_v57  ;;  %v370_v60 = vsel %vm214_vm3, %v368_v58, %v369_v57 }
  0xa6   : > { %377 = vst [vmem:[#allocation2 + $0x2c] sm:$0x3] %v373_v59  ;;  %v372_v61 = vsel %vm371_vm7, %v365_v54, %v370_v60  ;;  %v398_v62 = vpop.permute.xlu1 %397  ;;  %v396_v63 = vpop.permute.xlu0 %395 }
  0xa7   : > { %376 = vst [vmem:[#allocation2 + $0x24] sm:$0x33] %v372_v61  ;;  %v400_v0 = vrot.slane %v398_v62, 4  ;;  %v399_v1 = vrot.slane %v396_v63, 4 }
  0xa9   : > { %v404_v2 = vsel %vm402_vm8, %v398_v62, %v400_v0  ;;  %v401_v4 = vsel %vm214_vm3, %v399_v1, %v400_v0 }
  0xaa   : > { %408 = vst [vmem:[#allocation2 + $0x2c] sm:$0xc] %v404_v2  ;;  %v403_v5 = vsel %vm402_vm8, %v396_v63, %v401_v4  ;;  %v429_v6 = vpop.permute.xlu1 %428  ;;  %v427_v7 = vpop.permute.xlu0 %426 }
  0xab   : > { %407 = vst [vmem:[#allocation2 + $0x24] sm:$0xcc] %v403_v5  ;;  %v431_v8 = vrot.slane %v429_v6, 4  ;;  %v430_v9 = vrot.slane %v427_v7, 4 }
  0xad   : > { %v435_v10 = vsel %vm433_vm9, %v429_v6, %v431_v8  ;;  %v432_v11 = vsel %vm214_vm3, %v430_v9, %v431_v8 }
  0xae   : > { %439 = vst [vmem:[#allocation2 + $0x38] sm:$0x3] %v435_v10  ;;  %v434_v12 = vsel %vm433_vm9, %v427_v7, %v432_v11  ;;  %v2085_v10 = vsub.s32 1, %v1979_v3 }
  0xaf   : > { %438 = vst [vmem:[#allocation2 + $0x30] sm:$0x33] %v434_v12 }
  0xb1   : > { %v1809_v13 = vld [vmem:[#allocation2 + $0x20] ss:$12 sps:$4 sm:$0xff]  }
  0xb2   : > { %v1810_v15 = vld [vmem:[#allocation2 + $0x1c] ss:$12 sps:$4 sm:$0xff]   ;;  %v1812_v16 = vld [vmem:[#allocation2 + $0x18] ss:$12 sps:$4 sm:$0xff]   ;;  %1727 = vmatpush3.bf16.msra.mxu1 %v1809_v13 }
  0xb3   : > { %513 = vmatprep.subr.bf16.mxu0 %v1810_v15  ;;  %1728 = vmatprep.subr.bf16.mxu1 %v1884_v14  ;;  %v1892_v14 = vmov 1966171168  }
  0xb4   : > { %514 = vmatpush1.bf16.msra.mxu0 %v1812_v16  ;;  %v598_v24 = vunpack.c.l.s4 %v1892_v14 }
  0xb5   : > { %v1814_v17 = vld [vmem:[#allocation2 + $0x38] ss:$0 sps:$4 sm:$0x33]  }
  0xb6   : > { %v448_v18 = vld [vmem:[#allocation2 + $0x30] sm:$0x33]  ;;  %v509_v20 = vsel %vm501_vm10, %v1814_v17, 0  ;;  %v599_v25 = vunpack.c.0.s8 %v598_v24 }
  0xb7   : > { %v1708_v19 = vcombine.high %v448_v18, %v448_v18  ;;  %v1707_v21 = vcombine.low %v448_v18, %v448_v18  ;;  %1729 = vmatpush3.bf16.msra.mxu1 %v509_v20 }
  0xb8   : > { %v2010_v28 = vsub.s32 %v599_v25, %v1979_v3 }
  0xb9   : > { %1710 = vmatprep.subr.msk.bf16.mxu0 %vm501_vm10, %v1708_v19  ;;  %v503_v23 = vsel %vm501_vm10, %v1707_v21, 0 }
  0xba   : > { %516 = vmatpush1.bf16.msra.mxu0 %v503_v23  ;;  %1731 = vmatmul.mubr.msk.bf16.vlgmr.msra.gmra.mrb[0].mxu1 %vm497_vm11, %v450_v22 }
  0xbb   : > { %v455_v26 = vpop.permute.xlu0 %454 }
  0xbd   : > { %1711 = vmatmul.mubr.msk.bf16.vlgmr.msra.gmra.mrb[0].mxu0 %vm497_vm11, %v450_v22 }
 0x18d   : > { %v586_v27 = vpop.f32.mrb[0].mxu1 }
 0x18e   : > { %v587_v29 = vadd.f32 %v586_v27, %v455_v26  ;;  %v1732_v30 = vpop.f32.mrb[1].mxu1 }
 0x18f   : > { %v589_v32 = vpop.f32.mrb[2].mxu1 }
 0x190   : > { %v545_v31 = vpop.f32.mrb[0].mxu0  ;;  %v2013_v33 = vmax.f32 %v587_v29, 0.0  ;;  %v1733_v36 = vpop.f32.mrb[3].mxu1 }
 0x191   : > { %v546_v34 = vadd.f32 %v545_v31, %v455_v26  ;;  %v547_v35 = vpop.f32.mrb[1].mxu0 }
 0x192   : > { %v548_v37 = vadd.f32 %v547_v35, %v455_v26  ;;  %v549_v38 = vpop.f32.mrb[2].mxu0  ;;  %v1510_v42 = vrot.slane %v2013_v33, %v2010_v28  ;;  %v1503_v43 = vcombine.high %v2013_v33, %v2013_v33 }
 0x193   : > { %v592_v40 = vmax.f32 %v546_v34, 0.0  ;;  %v550_v41 = vpop.f32.mrb[3].mxu0 }
 0x194   : > { %v593_v44 = vmax.f32 %v548_v37, 0.0  ;;  %v1526_v47 = vrot.slane %v1510_v42, %v2010_v28  ;;  %v1518_v49 = vcombine.high %v1510_v42, %v1510_v42  ;;  %v1517_v56 = vrot.slane %v1503_v43, %v2010_v28 }
 0x195   : > { %v596_v45 = vcombine.high %v592_v40, %v592_v40  ;;  %v603_v46 = vrot.slane %v592_v40, %v2010_v28 }
 0x196   : > { %v1058_v48 = vcombine.high %v593_v44, %v593_v44  ;;  %v887_v50 = vcombine.low %v592_v40, %v593_v44  ;;  %v1555_v54 = vrot.slane %v1526_v47, %v2016_v39  ;;  %v1065_v62 = vrot.slane %v593_v44, %v2010_v28 }
 0x197   : > { %v610_v51 = vrot.slane %v596_v45, %v2010_v28  ;;  %v611_v52 = vcombine.high %v603_v46, %v603_v46  ;;  %v619_v53 = vrot.slane %v603_v46, %v2010_v28  ;;  %v2049_v63 = vrot.slane %v1518_v49, %v2010_v28 }
 0x198   : > { %v2030_v55 = vrot.slane %v1058_v48, %v2010_v28  ;;  %1584 = vrot.lane.b32.xlu0 %v1555_v54, %s1893_s26  ;;  %v1548_v4 = vcombine.high %v1526_v47, %v1526_v47  ;;  %v1519_v5 = vcombine.high %v1517_v56, %v1517_v56  ;;  %v895_v6 = vrot.slane %v887_v50, %v2010_v28 }
 0x199   : > { %v612_v57 = vcombine.high %v610_v51, %v610_v51  ;;  %v2034_v58 = vrot.slane %v610_v51, %v2010_v28  ;;  %v633_v59 = vrot.slane %v611_v52, %v2010_v28  ;;  %v2037_v60 = vcombine.high %v619_v53, %v619_v53  ;;  %654 = vst.msk [vmem:[%s2039_s25] sm:$0x1] %vm653_vm12, %v619_v53 }
 0x19a   : > { %v2045_v61 = vrot.slane %v619_v53, %v2016_v39  ;;  %v888_v7 = vcombine.high %v592_v40, %v593_v44  ;;  %v1559_v8 = vrot.slane %v2049_v63, %v2016_v39  ;;  %v2082_v9 = vrot.slane %v1065_v62, %v2010_v28 }
 0x19b   : > { %v2052_v0 = vrot.slane %v612_v57, %v2010_v28  ;;  %v2056_v1 = vcombine.high %v2034_v58, %v2034_v58  ;;  %v643_v2 = vcombine.high %v633_v59, %v633_v59  ;;  %655 = vst.msk [vmem:[%s2039_s25 + $0x10] sm:$0x1] %vm653_vm12, %v633_v59  ;;  %656 = vst.msk [vmem:[%s2039_s25 + $0x20] sm:$0x1] %vm653_vm12, %v2037_v60 }
 0x19c   : > { %658 = vst.msk [vmem:[%s2039_s25 + $0x40] sm:$0x1] %vm653_vm12, %v2034_v58  ;;  %694 = vrot.lane.b32.xlu1 %v2045_v61, %s1883_s4  ;;  %726 = vrot.lane.b32.xlu0 %v2045_v61, %s1887_s7  ;;  %v1073_v11 = vcombine.high %v1065_v62, %v1065_v62  ;;  %v2088_v12 = vrot.slane %v1517_v56, %v2010_v28 }
 0x19d   : > { %657 = vst.msk [vmem:[%s2039_s25 + $0x30] sm:$0x1] %vm653_vm12, %v643_v2  ;;  %659 = vst.msk [vmem:[%s2039_s25 + $0x50] sm:$0x1] %vm653_vm12, %v2052_v0  ;;  %v2091_v13 = vrot.slane %v895_v6, %v2010_v28  ;;  %v902_v15 = vrot.slane %v888_v7, %v2010_v28  ;;  %v1332_v16 = vcombine.low %v593_v44, %v2013_v33 }
 0x19e   : > { %660 = vst.msk [vmem:[%s2039_s25 + $0x60] sm:$0x1] %vm653_vm12, %v2056_v1  ;;  %v1333_v17 = vcombine.high %v593_v44, %v2013_v33  ;;  %v2098_v18 = vrot.slane %v643_v2, %v2016_v39  ;;  %v2102_v3 = vrot.slane %v2052_v0, %v2016_v39  ;;  %v2107_v19 = vrot.slane %v633_v59, %v2016_v39 }
 0x19f   : > { %v2110_v20 = vrot.slane %v1548_v4, %v2016_v39  ;;  %v2113_v21 = vrot.slane %v1519_v5, %v2010_v28  ;;  %v2116_v22 = vrot.slane %v902_v15, %v2010_v28  ;;  %v1340_v23 = vrot.slane %v1332_v16, %v2010_v28 }
 0x1a0   : > { %1586 = vrot.lane.b32.xlu1 %v1559_v8, %s1893_s26  ;;  %758 = vrot.lane.b32.xlu0 %v2045_v61, %s1894_s27  ;;  %v1347_v14 = vrot.slane %v1333_v17, %v2010_v28  ;;  %v940_v24 = vrot.slane %v2091_v13, %v2016_v39  ;;  %v1103_v25 = vcombine.high %v2082_v9, %v2082_v9 }
 0x1a1   : > { %v2125_v26 = vrot.slane %v1073_v11, %v2010_v28  ;;  %v972_v27 = vrot.slane %v2116_v22, %v2016_v39  ;;  %v1088_v29 = vrot.slane %v2030_v55, %v2010_v28  ;;  %v903_v30 = vcombine.high %v895_v6, %v895_v6 }
 0x1a2   : > { %v1549_v31 = vcombine.high %v2088_v12, %v2088_v12  ;;  %v2136_v32 = vrot.slane %v1340_v23, %v2010_v28  ;;  %v1348_v33 = vcombine.high %v1340_v23, %v1340_v23  ;;  %v2139_v34 = vrot.slane %v1347_v14, %v2010_v28 }
 0x1a3   : > { %v2144_v35 = vrot.slane %v1103_v25, %v2016_v39  ;;  %v2147_v36 = vrot.slane %v1088_v29, %v2016_v39  ;;  %v2150_v37 = vrot.slane %v903_v30, %v2010_v28  ;;  %v2154_v38 = vcombine.high %v2091_v13, %v2091_v13 }
 0x1a4   : > { %696 = vrot.lane.b32.xlu1 %v2107_v19, %s1883_s4  ;;  %790 = vrot.lane.b32.xlu0 %v2045_v61, %s1895_s28  ;;  %v1551_v40 = vcombine.high %v2113_v21, %v2113_v21  ;;  %v1349_v41 = vcombine.high %v1347_v14, %v1347_v14  ;;  %v904_v42 = vcombine.high %v902_v15, %v902_v15 }
 0x1a5   : > { %v2160_v43 = vcombine.high %v2116_v22, %v2116_v22  ;;  %v952_v44 = vrot.slane %v2150_v37, %v2085_v10  ;;  %v960_v45 = vrot.slane %v2154_v38, %v2085_v10  ;;  %v1105_v46 = vcombine.high %v2125_v26, %v2125_v26 }
 0x1a6   : > { %v1074_v47 = vcombine.high %v2030_v55, %v2030_v55  ;;  %v2173_v48 = vrot.slane %v904_v42, %v2010_v28  ;;  %v1385_v50 = vrot.slane %v2136_v32, %v2016_v39  ;;  %v1417_v51 = vrot.slane %v2139_v34, %v2016_v39 }
 0x1a7   : > { %v992_v49 = vrot.slane %v2160_v43, %v2085_v10  ;;  %v2184_v52 = vrot.slane %v1105_v46, %v2016_v39  ;;  %v2189_v54 = vrot.slane %v2056_v1, %v2016_v39  ;;  %v2192_v55 = vrot.slane %v1348_v33, %v2010_v28 }
 0x1a8   : > { %728 = vrot.lane.b32.xlu1 %v2107_v19, %s1887_s7  ;;  %822 = vrot.lane.b32.xlu0 %v2045_v61, %s1896_s29  ;;  %v1102_v53 = vrot.slane %v1074_v47, %v2010_v28  ;;  %v984_v56 = vrot.slane %v2173_v48, %v2085_v10  ;;  %v2198_v57 = vcombine.high %v2136_v32, %v2136_v32 }
 0x1a9   : > { %v948_v59 = vrot.slane %v2150_v37, %v2016_v39  ;;  %v2203_v62 = vrot.slane %v1349_v41, %v2010_v28  ;;  %v1397_v1 = vrot.slane %v2192_v55, %v2085_v10  ;;  %v956_v4 = vrot.slane %v2154_v38, %v2016_v39 }
 0x1aa   : > { %v2206_v2 = vrot.slane %v1102_v53, %v2016_v39  ;;  %v2214_v5 = vcombine.high %v2139_v34, %v2139_v34  ;;  %v1405_v28 = vrot.slane %v2198_v57, %v2085_v10  ;;  %v980_v7 = vrot.slane %v2173_v48, %v2016_v39 }
 0x1ab   : > { %v1429_v6 = vrot.slane %v2203_v62, %v2085_v10  ;;  %v988_v8 = vrot.slane %v2160_v43, %v2016_v39  ;;  %v1104_v15 = vcombine.high %v1088_v29, %v1088_v29  ;;  %v644_v16 = vcombine.high %v2052_v0, %v2052_v0 }
 0x1ac   : > { %760 = vrot.lane.b32.xlu1 %v2107_v19, %s1894_s27  ;;  %854 = vrot.lane.b32.xlu0 %v2045_v61, %s1897_s30  ;;  %v1437_v11 = vrot.slane %v2214_v5, %v2085_v10  ;;  %v1393_v17 = vrot.slane %v2192_v55, %v2016_v39  ;;  %v1401_v23 = vrot.slane %v2198_v57, %v2016_v39 }
 0x1ad   : > { %v2238_v14 = vcombine.high %v2150_v37, %v2150_v37  ;;  %v2244_v25 = vcombine.high %v2173_v48, %v2173_v48  ;;  %v2247_v29 = vrot.slane %v1104_v15, %v2016_v39  ;;  %v2250_v0 = vrot.slane %v644_v16, %v2016_v39  ;;  %661 = vst.msk [vmem:[%s2039_s25 + $0x70] sm:$0x1] %vm653_vm12, %v644_v16 }
 0x1ae   : > { %v1106_v33 = vcombine.high %v1102_v53, %v1102_v53  ;;  %v2273_v15 = vcombine.high %v2192_v55, %v2192_v55  ;;  %v2277_v16 = vcombine.high %v2203_v62, %v2203_v62  ;;  %v2283_v46 = vrot.slane %v1549_v31, %v2016_v39 }
 0x1af   : > { %v968_v41 = vrot.slane %v2238_v14, %v2085_v10  ;;  %v1110_v31 = vrot.slane %v2082_v9, %v2016_v39  ;;  %v976_v9 = vrot.slane %v2116_v22, %v2085_v10 }
 0x1b0   : > { %792 = vrot.lane.b32.xlu1 %v2107_v19, %s1895_s28  ;;  %1588 = vrot.lane.b32.xlu0 %v2110_v20, %s1893_s26  ;;  %v2269_v53 = vrot.slane %v1106_v33, %v2016_v39  ;;  %v1571_v20 = vrot.slane %v2088_v12, %v2016_v39  ;;  %v2288_v33 = vrot.slane %v1551_v40, %v2016_v39 }
 0x1b1   : > { %v1409_v47 = vrot.slane %v2273_v15, %v2016_v39  ;;  %v1441_v30 = vrot.slane %v2277_v16, %v2016_v39  ;;  %v1413_v42 = vrot.slane %v2273_v15, %v2085_v10  ;;  %v1445_v61 = vrot.slane %v2277_v16, %v2085_v10 }
 0x1b2   : > { %v1550_v12 = vcombine.high %v2049_v63, %v2049_v63  ;;  %v944_v63 = vrot.slane %v2091_v13, %v2085_v10 }
 0x1b4   : > { %824 = vrot.lane.b32.xlu1 %v2107_v19, %s1896_s29  ;;  %1592 = vrot.lane.b32.xlu0 %v1571_v20, %s1893_s26  ;;  %v1567_v40 = vrot.slane %v1550_v12, %v2016_v39  ;;  %v1575_v20 = vrot.slane %v2113_v21, %v2016_v39  ;;  %v673_v21 = vrot.slane %v2037_v60, %v2016_v39 }
 0x1b5   : > { %v681_v12 = vrot.slane %v2034_v58, %v2016_v39  ;;  %v1389_v60 = vrot.slane %v2136_v32, %v2085_v10  ;;  %v1421_v58 = vrot.slane %v2139_v34, %v2085_v10 }
 0x1b8   : > { %856 = vrot.lane.b32.xlu1 %v2107_v19, %s1897_s30  ;;  %1139 = vrot.lane.b32.xlu0 %v1110_v31, %s1898_s5  ;;  %v1114_v19 = vrot.slane %v2125_v26, %v2016_v39 }
 0x1bc   : > { %1590 = vrot.lane.b32.xlu1 %v1567_v40, %s1893_s26  ;;  %1171 = vrot.lane.b32.xlu0 %v1110_v31, %s1899_s6 }
 0x1c0   : > { %1594 = vrot.lane.b32.xlu1 %v1575_v20, %s1893_s26  ;;  %1203 = vrot.lane.b32.xlu0 %v1110_v31, %s1900_s8 }
 0x1c4   : > { %1003 = vrot.lane.b32.xlu1 %v944_v63, %s1901_s9  ;;  %1235 = vrot.lane.b32.xlu0 %v1110_v31, %s1902_s10 }
 0x1c8   : > { %1019 = vrot.lane.b32.xlu1 %v976_v9, %s1901_s9  ;;  %1267 = vrot.lane.b32.xlu0 %v1110_v31, %s1903_s11 }
 0x1cc   : > { %1141 = vrot.lane.b32.xlu1 %v1114_v19, %s1898_s5  ;;  %1299 = vrot.lane.b32.xlu0 %v1110_v31, %s1904_s17 }
 0x1d0   : > { %1173 = vrot.lane.b32.xlu1 %v1114_v19, %s1899_s6  ;;  %698 = vrot.lane.b32.xlu0 %v673_v21, %s1883_s4 }
 0x1d4   : > { %1205 = vrot.lane.b32.xlu1 %v1114_v19, %s1900_s8  ;;  %702 = vrot.lane.b32.xlu0 %v681_v12, %s1883_s4 }
 0x1d8   : > { %1237 = vrot.lane.b32.xlu1 %v1114_v19, %s1902_s10  ;;  %730 = vrot.lane.b32.xlu0 %v673_v21, %s1887_s7 }
 0x1dc   : > { %1269 = vrot.lane.b32.xlu1 %v1114_v19, %s1903_s11  ;;  %734 = vrot.lane.b32.xlu0 %v681_v12, %s1887_s7 }
 0x1e0   : > { %1301 = vrot.lane.b32.xlu1 %v1114_v19, %s1904_s17  ;;  %762 = vrot.lane.b32.xlu0 %v673_v21, %s1894_s27 }
 0x1e4   : > { %1448 = vrot.lane.b32.xlu1 %v1389_v60, %s1905_s19  ;;  %766 = vrot.lane.b32.xlu0 %v681_v12, %s1894_s27 }
 0x1e8   : > { %1464 = vrot.lane.b32.xlu1 %v1421_v58, %s1905_s19  ;;  %794 = vrot.lane.b32.xlu0 %v673_v21, %s1895_s28 }
 0x1ec   : > { %700 = vrot.lane.b32.xlu1 %v2098_v18, %s1883_s4  ;;  %798 = vrot.lane.b32.xlu0 %v681_v12, %s1895_s28 }
 0x1f0   : > { %704 = vrot.lane.b32.xlu1 %v2102_v3, %s1883_s4  ;;  %826 = vrot.lane.b32.xlu0 %v673_v21, %s1896_s29 }
 0x1f4   : > { %732 = vrot.lane.b32.xlu1 %v2098_v18, %s1887_s7  ;;  %830 = vrot.lane.b32.xlu0 %v681_v12, %s1896_s29 }
 0x1f8   : > { %736 = vrot.lane.b32.xlu1 %v2102_v3, %s1887_s7  ;;  %858 = vrot.lane.b32.xlu0 %v673_v21, %s1897_s30 }
 0x1fc   : > { %764 = vrot.lane.b32.xlu1 %v2098_v18, %s1894_s27  ;;  %862 = vrot.lane.b32.xlu0 %v681_v12, %s1897_s30 }
 0x200   : > { %768 = vrot.lane.b32.xlu1 %v2102_v3, %s1894_s27  ;;  %1001 = vrot.lane.b32.xlu0 %v940_v24, %s1901_s9 }
 0x204   : > { %796 = vrot.lane.b32.xlu1 %v2098_v18, %s1895_s28  ;;  %1017 = vrot.lane.b32.xlu0 %v972_v27, %s1901_s9 }
 0x208   : > { %800 = vrot.lane.b32.xlu1 %v2102_v3, %s1895_s28  ;;  %1143 = vrot.lane.b32.xlu0 %v2144_v35, %s1898_s5 }
 0x20a   : > { %v1585_v26 = vpop.permute.xlu0 %1584 }
 0x20b   : > { %1608 = vst.msk [vmem:[%s2039_s25 + $0xf] sm:$0x1] %vm653_vm12, %v1585_v26 }
 0x20c   : > { %828 = vrot.lane.b32.xlu1 %v2098_v18, %s1896_s29  ;;  %1147 = vrot.lane.b32.xlu0 %v2147_v36, %s1898_s5 }
 0x20e   : > { %v695_v13 = vpop.permute.xlu1 %694  ;;  %v727_v22 = vpop.permute.xlu0 %726 }
 0x20f   : > { %718 = vst.msk [vmem:[%s2039_s25 + $0x1] sm:$0x1] %vm653_vm12, %v695_v13  ;;  %750 = vst.msk [vmem:[%s2039_s25 + $0x2] sm:$0x1] %vm653_vm12, %v727_v22 }
 0x210   : > { %832 = vrot.lane.b32.xlu1 %v2102_v3, %s1896_s29  ;;  %1175 = vrot.lane.b32.xlu0 %v2144_v35, %s1899_s6 }
 0x212   : > { %v1587_v24 = vpop.permute.xlu1 %1586  ;;  %v759_v27 = vpop.permute.xlu0 %758 }
 0x213   : > { %1609 = vst.msk [vmem:[%s2039_s25 + $0x1f] sm:$0x1] %vm653_vm12, %v1587_v24  ;;  %782 = vst.msk [vmem:[%s2039_s25 + $0x3] sm:$0x1] %vm653_vm12, %v759_v27 }
 0x214   : > { %860 = vrot.lane.b32.xlu1 %v2098_v18, %s1897_s30  ;;  %1179 = vrot.lane.b32.xlu0 %v2147_v36, %s1899_s6 }
 0x216   : > { %v697_v31 = vpop.permute.xlu1 %696  ;;  %v791_v40 = vpop.permute.xlu0 %790 }
 0x217   : > { %719 = vst.msk [vmem:[%s2039_s25 + $0x11] sm:$0x1] %vm653_vm12, %v697_v31  ;;  %814 = vst.msk [vmem:[%s2039_s25 + $0x4] sm:$0x1] %vm653_vm12, %v791_v40 }
 0x218   : > { %864 = vrot.lane.b32.xlu1 %v2102_v3, %s1897_s30  ;;  %1207 = vrot.lane.b32.xlu0 %v2144_v35, %s1900_s8 }
 0x21a   : > { %v729_v18 = vpop.permute.xlu1 %728  ;;  %v823_v20 = vpop.permute.xlu0 %822 }
 0x21b   : > { %751 = vst.msk [vmem:[%s2039_s25 + $0x12] sm:$0x1] %vm653_vm12, %v729_v18  ;;  %846 = vst.msk [vmem:[%s2039_s25 + $0x5] sm:$0x1] %vm653_vm12, %v823_v20 }
 0x21c   : > { %1007 = vrot.lane.b32.xlu1 %v952_v44, %s1901_s9  ;;  %1211 = vrot.lane.b32.xlu0 %v2147_v36, %s1900_s8 }
 0x21e   : > { %v761_v3 = vpop.permute.xlu1 %760  ;;  %v855_v63 = vpop.permute.xlu0 %854 }
 0x21f   : > { %783 = vst.msk [vmem:[%s2039_s25 + $0x13] sm:$0x1] %vm653_vm12, %v761_v3  ;;  %878 = vst.msk [vmem:[%s2039_s25 + $0x6] sm:$0x1] %vm653_vm12, %v855_v63 }
 0x220   : > { %1011 = vrot.lane.b32.xlu1 %v960_v45, %s1901_s9  ;;  %1239 = vrot.lane.b32.xlu0 %v2144_v35, %s1902_s10 }
 0x222   : > { %v793_v44 = vpop.permute.xlu1 %792  ;;  %v1589_v9 = vpop.permute.xlu0 %1588 }
 0x223   : > { %815 = vst.msk [vmem:[%s2039_s25 + $0x14] sm:$0x1] %vm653_vm12, %v793_v44  ;;  %1610 = vst.msk [vmem:[%s2039_s25 + $0x2f] sm:$0x1] %vm653_vm12, %v1589_v9 }
 0x224   : > { %1023 = vrot.lane.b32.xlu1 %v984_v56, %s1901_s9  ;;  %1243 = vrot.lane.b32.xlu0 %v2147_v36, %s1902_s10 }
 0x226   : > { %v825_v45 = vpop.permute.xlu1 %824  ;;  %v1593_v19 = vpop.permute.xlu0 %1592 }
 0x227   : > { %847 = vst.msk [vmem:[%s2039_s25 + $0x15] sm:$0x1] %vm653_vm12, %v825_v45  ;;  %1612 = vst.msk [vmem:[%s2039_s25 + $0x4f] sm:$0x1] %vm653_vm12, %v1593_v19 }
 0x228   : > { %1027 = vrot.lane.b32.xlu1 %v992_v49, %s1901_s9  ;;  %1271 = vrot.lane.b32.xlu0 %v2144_v35, %s1903_s11 }
 0x22a   : > { %v857_v56 = vpop.permute.xlu1 %856  ;;  %v1140_v21 = vpop.permute.xlu0 %1139 }
 0x22b   : > { %879 = vst.msk [vmem:[%s2039_s25 + $0x16] sm:$0x1] %vm653_vm12, %v857_v56  ;;  %1163 = vst.msk [vmem:[%s2039_s25 + $0x8] sm:$0x1] %vm653_vm12, %v1140_v21 }
 0x22c   : > { %1145 = vrot.lane.b32.xlu1 %v2184_v52, %s1898_s5  ;;  %1275 = vrot.lane.b32.xlu0 %v2147_v36, %s1903_s11 }
 0x22e   : > { %v1591_v49 = vpop.permute.xlu1 %1590  ;;  %v1172_v12 = vpop.permute.xlu0 %1171 }
 0x22f   : > { %1611 = vst.msk [vmem:[%s2039_s25 + $0x3f] sm:$0x1] %vm653_vm12, %v1591_v49  ;;  %1195 = vst.msk [vmem:[%s2039_s25 + $0x9] sm:$0x1] %vm653_vm12, %v1172_v12 }
 0x230   : > { %1149 = vrot.lane.b32.xlu1 %v2206_v2, %s1898_s5  ;;  %1446 = vrot.lane.b32.xlu0 %v1385_v50, %s1905_s19 }
 0x232   : > { %v1595_v60 = vpop.permute.xlu1 %1594  ;;  %v1204_v58 = vpop.permute.xlu0 %1203 }
 0x233   : > { %1613 = vst.msk [vmem:[%s2039_s25 + $0x5f] sm:$0x1] %vm653_vm12, %v1595_v60  ;;  %1227 = vst.msk [vmem:[%s2039_s25 + $0xa] sm:$0x1] %vm653_vm12, %v1204_v58 }
 0x234   : > { %1177 = vrot.lane.b32.xlu1 %v2184_v52, %s1899_s6  ;;  %1462 = vrot.lane.b32.xlu0 %v1417_v51, %s1905_s19 }
 0x236   : > { %v2478_v26 = vpop.permute.xlu1 %1003  ;;  %v1236_v32 = vpop.permute.xlu0 %1235 }
 0x237   : > { %1259 = vst.msk [vmem:[%s2039_s25 + $0xb] sm:$0x1] %vm653_vm12, %v1236_v32 }
 0x238   : > { %1181 = vrot.lane.b32.xlu1 %v2206_v2, %s1899_s6  ;;  %1303 = vrot.lane.b32.xlu0 %v2144_v35, %s1904_s17 }
 0x23a   : > { %v2486_v50 = vpop.permute.xlu1 %1019  ;;  %v1268_v13 = vpop.permute.xlu0 %1267 }
 0x23b   : > { %1291 = vst.msk [vmem:[%s2039_s25 + $0xc] sm:$0x1] %vm653_vm12, %v1268_v13 }
 0x23c   : > { %1209 = vrot.lane.b32.xlu1 %v2184_v52, %s1900_s8  ;;  %1307 = vrot.lane.b32.xlu0 %v2147_v36, %s1904_s17 }
 0x23e   : > { %v1142_v34 = vpop.permute.xlu1 %1141  ;;  %v1300_v51 = vpop.permute.xlu0 %1299 }
 0x23f   : > { %1164 = vst.msk [vmem:[%s2039_s25 + $0x18] sm:$0x1] %vm653_vm12, %v1142_v34  ;;  %1323 = vst.msk [vmem:[%s2039_s25 + $0xd] sm:$0x1] %vm653_vm12, %v1300_v51 }
 0x240   : > { %1213 = vrot.lane.b32.xlu1 %v2206_v2, %s1900_s8  ;;  %706 = vrot.lane.b32.xlu0 %v2189_v54, %s1883_s4 }
 0x242   : > { %v1174_v35 = vpop.permute.xlu1 %1173  ;;  %v699_v22 = vpop.permute.xlu0 %698 }
 0x243   : > { %1196 = vst.msk [vmem:[%s2039_s25 + $0x19] sm:$0x1] %vm653_vm12, %v1174_v35  ;;  %720 = vst.msk [vmem:[%s2039_s25 + $0x21] sm:$0x1] %vm653_vm12, %v699_v22 }
 0x244   : > { %1241 = vrot.lane.b32.xlu1 %v2184_v52, %s1902_s10  ;;  %738 = vrot.lane.b32.xlu0 %v2189_v54, %s1887_s7 }
 0x246   : > { %v1206_v36 = vpop.permute.xlu1 %1205  ;;  %v703_v24 = vpop.permute.xlu0 %702 }
 0x247   : > { %1228 = vst.msk [vmem:[%s2039_s25 + $0x1a] sm:$0x1] %vm653_vm12, %v1206_v36  ;;  %722 = vst.msk [vmem:[%s2039_s25 + $0x41] sm:$0x1] %vm653_vm12, %v703_v24 }
 0x248   : > { %1245 = vrot.lane.b32.xlu1 %v2206_v2, %s1902_s10  ;;  %770 = vrot.lane.b32.xlu0 %v2189_v54, %s1894_s27 }
 0x24a   : > { %v1238_v27 = vpop.permute.xlu1 %1237  ;;  %v731_v31 = vpop.permute.xlu0 %730 }
 0x24b   : > { %1260 = vst.msk [vmem:[%s2039_s25 + $0x1b] sm:$0x1] %vm653_vm12, %v1238_v27  ;;  %752 = vst.msk [vmem:[%s2039_s25 + $0x22] sm:$0x1] %vm653_vm12, %v731_v31 }
 0x24c   : > { %1273 = vrot.lane.b32.xlu1 %v2184_v52, %s1903_s11  ;;  %802 = vrot.lane.b32.xlu0 %v2189_v54, %s1895_s28 }
 0x24e   : > { %v1270_v40 = vpop.permute.xlu1 %1269  ;;  %v735_v18 = vpop.permute.xlu0 %734 }
 0x24f   : > { %1292 = vst.msk [vmem:[%s2039_s25 + $0x1c] sm:$0x1] %vm653_vm12, %v1270_v40  ;;  %754 = vst.msk [vmem:[%s2039_s25 + $0x42] sm:$0x1] %vm653_vm12, %v735_v18 }
 0x250   : > { %1277 = vrot.lane.b32.xlu1 %v2206_v2, %s1903_s11  ;;  %834 = vrot.lane.b32.xlu0 %v2189_v54, %s1896_s29 }
 0x252   : > { %v1302_v20 = vpop.permute.xlu1 %1301  ;;  %v763_v3 = vpop.permute.xlu0 %762 }
 0x253   : > { %1324 = vst.msk [vmem:[%s2039_s25 + $0x1d] sm:$0x1] %vm653_vm12, %v1302_v20  ;;  %784 = vst.msk [vmem:[%s2039_s25 + $0x23] sm:$0x1] %vm653_vm12, %v763_v3 }
 0x254   : > { %1452 = vrot.lane.b32.xlu1 %v1397_v1, %s1905_s19  ;;  %866 = vrot.lane.b32.xlu0 %v2189_v54, %s1897_s30 }
 0x256   : > { %v2544_v63 = vpop.permute.xlu1 %1448  ;;  %v767_v44 = vpop.permute.xlu0 %766 }
 0x257   : > { %786 = vst.msk [vmem:[%s2039_s25 + $0x43] sm:$0x1] %vm653_vm12, %v767_v44 }
 0x258   : > { %1456 = vrot.lane.b32.xlu1 %v1405_v28, %s1905_s19  ;;  %1005 = vrot.lane.b32.xlu0 %v948_v59, %s1901_s9 }
 0x25a   : > { %v2556_v1 = vpop.permute.xlu1 %1464  ;;  %v795_v54 = vpop.permute.xlu0 %794 }
 0x25b   : > { %816 = vst.msk [vmem:[%s2039_s25 + $0x24] sm:$0x1] %vm653_vm12, %v795_v54 }
 0x25c   : > { %1468 = vrot.lane.b32.xlu1 %v1429_v6, %s1905_s19  ;;  %1009 = vrot.lane.b32.xlu0 %v956_v4, %s1901_s9 }
 0x25e   : > { %v701_v28 = vpop.permute.xlu1 %700  ;;  %v799_v37 = vpop.permute.xlu0 %798 }
 0x25f   : > { %721 = vst.msk [vmem:[%s2039_s25 + $0x31] sm:$0x1] %vm653_vm12, %v701_v28  ;;  %818 = vst.msk [vmem:[%s2039_s25 + $0x44] sm:$0x1] %vm653_vm12, %v799_v37 }
 0x260   : > { %1472 = vrot.lane.b32.xlu1 %v1437_v11, %s1905_s19  ;;  %1021 = vrot.lane.b32.xlu0 %v980_v7, %s1901_s9 }
 0x262   : > { %v705_v38 = vpop.permute.xlu1 %704  ;;  %v827_v59 = vpop.permute.xlu0 %826 }
 0x263   : > { %723 = vst.msk [vmem:[%s2039_s25 + $0x51] sm:$0x1] %vm653_vm12, %v705_v38  ;;  %848 = vst.msk [vmem:[%s2039_s25 + $0x25] sm:$0x1] %vm653_vm12, %v827_v59 }
 0x264   : > { %1305 = vrot.lane.b32.xlu1 %v2184_v52, %s1904_s17  ;;  %1025 = vrot.lane.b32.xlu0 %v988_v8, %s1901_s9 }
 0x266   : > { %v733_v4 = vpop.permute.xlu1 %732  ;;  %v831_v48 = vpop.permute.xlu0 %830 }
 0x267   : > { %753 = vst.msk [vmem:[%s2039_s25 + $0x32] sm:$0x1] %vm653_vm12, %v733_v4  ;;  %850 = vst.msk [vmem:[%s2039_s25 + $0x45] sm:$0x1] %vm653_vm12, %v831_v48 }
 0x268   : > { %1309 = vrot.lane.b32.xlu1 %v2206_v2, %s1904_s17  ;;  %1151 = vrot.lane.b32.xlu0 %v2247_v29, %s1898_s5 }
 0x26a   : > { %v737_v52 = vpop.permute.xlu1 %736  ;;  %v859_v6 = vpop.permute.xlu0 %858 }
 0x26b   : > { %755 = vst.msk [vmem:[%s2039_s25 + $0x52] sm:$0x1] %vm653_vm12, %v737_v52  ;;  %880 = vst.msk [vmem:[%s2039_s25 + $0x26] sm:$0x1] %vm653_vm12, %v859_v6 }
 0x26c   : > { %708 = vrot.lane.b32.xlu1 %v2250_v0, %s1883_s4  ;;  %1183 = vrot.lane.b32.xlu0 %v2247_v29, %s1899_s6  ;;  %s1719_s4 = sshll.u32 %s1950_s16, 11 }
 0x26e   : > { %v765_v43 = vpop.permute.xlu1 %764  ;;  %v863_v2 = vpop.permute.xlu0 %862 }
 0x26f   : > { %785 = vst.msk [vmem:[%s2039_s25 + $0x33] sm:$0x1] %vm653_vm12, %v765_v43  ;;  %882 = vst.msk [vmem:[%s2039_s25 + $0x46] sm:$0x1] %vm653_vm12, %v863_v2 }
 0x270   : > { %740 = vrot.lane.b32.xlu1 %v2250_v0, %s1887_s7  ;;  %1215 = vrot.lane.b32.xlu0 %v2247_v29, %s1900_s8  ;;  %s1630_s7 = sshll.u32 %s2039_s25, 4  ;;  %s2875_s7 = int_to_ptr.vmem [resolvable:$true] %s1630_s7 }
 0x271   : > { %s1816_s16 = scalar_lea.vmem %s2875_s7, 2048 }
 0x272   : > { %v769_v7 = vpop.permute.xlu1 %768  ;;  %v1002_v8 = vpop.permute.xlu0 %1001  ;;  %p1817_p11 = scmp.ne.s32.totalorder %s2875_s7, %s1816_s16 }
 0x273   : > { %787 = vst.msk [vmem:[%s2039_s25 + $0x53] sm:$0x1] %vm653_vm12, %v769_v7  ;;  %v1034_v11 = vsel %vm1033_vm13, %v1002_v8, %v2478_v26 }
 0x274   : > { %772 = vrot.lane.b32.xlu1 %v2250_v0, %s1894_s27  ;;  %1050 = vst.msk [vmem:[%s2039_s25 + $0x7] sm:$0x1] %vm653_vm12, %v1034_v11  ;;  %1247 = vrot.lane.b32.xlu0 %v2247_v29, %s1902_s10  ;;  %s2873_s27 = scalar_lea.hbm %s2925_s3, %s1719_s4  ;;  %p1818_p12 = pnand %p1817_p11, %p1967_p5 }
 0x276   : > { %v797_v9 = vpop.permute.xlu1 %796  ;;  %v1018_v45 = vpop.permute.xlu0 %1017  ;;  %p1819_p13 = pneg %p1818_p12 }
 0x277   : > { %817 = vst.msk [vmem:[%s2039_s25 + $0x34] sm:$0x1] %vm653_vm12, %v797_v9  ;;  %v1038_v19 = vsel %vm1033_vm13, %v1018_v45, %v2486_v50 }
 0x278   : > { %804 = vrot.lane.b32.xlu1 %v2250_v0, %s1895_s28  ;;  %1054 = vst.msk [vmem:[%s2039_s25 + $0x47] sm:$0x1] %vm653_vm12, %v1038_v19  ;;  %1279 = vrot.lane.b32.xlu0 %v2247_v29, %s1903_s11  ;;  %s2881_s28 = scalar_lea.sflag [#allocation4], %s161_s20 }
 0x27a   : > { %v801_v56 = vpop.permute.xlu1 %800  ;;  %v1144_v21 = vpop.permute.xlu0 %1143 }
 0x27b   : > { %819 = vst.msk [vmem:[%s2039_s25 + $0x54] sm:$0x1] %vm653_vm12, %v801_v56  ;;  %1165 = vst.msk [vmem:[%s2039_s25 + $0x28] sm:$0x1] %vm653_vm12, %v1144_v21 }
 0x27c   : > { %836 = vrot.lane.b32.xlu1 %v2250_v0, %s1896_s29  ;;  %1450 = vrot.lane.b32.xlu0 %v1393_v17, %s1905_s19  ;;  %v2928_v17 = vrot.slane %v2203_v62, %v2016_v39  ;;  %s1906_s29 = smov [#allocation3]  }
 0x27e   : > { %v829_v49 = vpop.permute.xlu1 %828  ;;  %v1148_v12 = vpop.permute.xlu0 %1147 }
 0x27f   : > { %849 = vst.msk [vmem:[%s2039_s25 + $0x35] sm:$0x1] %vm653_vm12, %v829_v49  ;;  %1167 = vst.msk [vmem:[%s2039_s25 + $0x48] sm:$0x1] %vm653_vm12, %v1148_v12 }
 0x280   : > { %868 = vrot.lane.b32.xlu1 %v2250_v0, %s1897_s30  ;;  %1454 = vrot.lane.b32.xlu0 %v1401_v23, %s1905_s19  ;;  %v2929_v0 = vrot.slane %v2244_v25, %v2085_v10  ;;  %s1820_s30 = sshll.u32 %s1906_s29, 4  ;;  %s1821_s30 = int_to_ptr.vmem [resolvable:$false] %s1820_s30 }
 0x281   : > { %p1823_p0 = scmp.lt.s32.totalorder %s2875_s7, %s1821_s30 }
 0x282   : > { %v833_v60 = vpop.permute.xlu1 %832  ;;  %v1176_v55 = vpop.permute.xlu0 %1175 }
 0x283   : > { %851 = vst.msk [vmem:[%s2039_s25 + $0x55] sm:$0x1] %vm653_vm12, %v833_v60  ;;  %1197 = vst.msk [vmem:[%s2039_s25 + $0x29] sm:$0x1] %vm653_vm12, %v1176_v55 }
 0x284   : > { %1015 = vrot.lane.b32.xlu1 %v968_v41, %s1901_s9  ;;  %1466 = vrot.lane.b32.xlu0 %v2928_v17, %s1905_s19  ;;  %v2930_v41 = vrot.slane %v2214_v5, %v2016_v39  ;;  %v2931_v5 = vrot.slane %v2238_v14, %v2016_v39 }
 0x286   : > { %v861_v57 = vpop.permute.xlu1 %860  ;;  %v1180_v23 = vpop.permute.xlu0 %1179 }
 0x287   : > { %881 = vst.msk [vmem:[%s2039_s25 + $0x36] sm:$0x1] %vm653_vm12, %v861_v57  ;;  %1199 = vst.msk [vmem:[%s2039_s25 + $0x49] sm:$0x1] %vm653_vm12, %v1180_v23 }
 0x288   : > { %1031 = vrot.lane.b32.xlu1 %v2929_v0, %s1901_s9  ;;  %1470 = vrot.lane.b32.xlu0 %v2930_v41, %s1905_s19 }
 0x28a   : > { %v865_v62 = vpop.permute.xlu1 %864  ;;  %v1208_v58 = vpop.permute.xlu0 %1207 }
 0x28b   : > { %883 = vst.msk [vmem:[%s2039_s25 + $0x56] sm:$0x1] %vm653_vm12, %v865_v62  ;;  %1229 = vst.msk [vmem:[%s2039_s25 + $0x2a] sm:$0x1] %vm653_vm12, %v1208_v58 }
 0x28c   : > { %1153 = vrot.lane.b32.xlu1 %v2269_v53, %s1898_s5  ;;  %1311 = vrot.lane.b32.xlu0 %v2247_v29, %s1904_s17  ;;  %v2932_v29 = vrot.slane %v2244_v25, %v2016_v39  ;;  %s1822_s5 = scalar_lea.vmem %s1821_s30, 4096 }
 0x28d   : > { %p1824_p1 = scmp.lt.s32.totalorder %s1822_s5, %s1816_s16 }
 0x28e   : > { %v2686_v26 = vpop.permute.xlu1 %1007  ;;  %v1212_v32 = vpop.permute.xlu0 %1211 }
 0x28f   : > { %1231 = vst.msk [vmem:[%s2039_s25 + $0x4a] sm:$0x1] %vm653_vm12, %v1212_v32  ;;  %p1825_p2 = por %p1824_p1, %p1823_p0 }
 0x290   : > { %1185 = vrot.lane.b32.xlu1 %v2269_v53, %s1899_s6  ;;  %1013 = vrot.lane.b32.xlu0 %v2931_v5, %s1901_s9 }
 0x291   : > { %p1826_p3 = pnand %p1825_p2, %p1819_p13 }
 0x292   : > { %v2696_v50 = vpop.permute.xlu1 %1011  ;;  %v1240_v13 = vpop.permute.xlu0 %1239 }
 0x293   : > { %1261 = vst.msk [vmem:[%s2039_s25 + $0x2b] sm:$0x1] %vm653_vm12, %v1240_v13 }
 0x294   : > { %1217 = vrot.lane.b32.xlu1 %v2269_v53, %s1900_s8  ;;  %1029 = vrot.lane.b32.xlu0 %v2932_v29, %s1901_s9 }
 0x296   : > { %v2706_v34 = vpop.permute.xlu1 %1023  ;;  %v1244_v51 = vpop.permute.xlu0 %1243 }
 0x297   : > { %1263 = vst.msk [vmem:[%s2039_s25 + $0x4b] sm:$0x1] %vm653_vm12, %v1244_v51 }
 0x298   : > { %1249 = vrot.lane.b32.xlu1 %v2269_v53, %s1902_s10  ;;  %1458 = vrot.lane.b32.xlu0 %v1409_v47, %s1905_s19 }
 0x29a   : > { %v2716_v14 = vpop.permute.xlu1 %1027  ;;  %v1272_v35 = vpop.permute.xlu0 %1271 }
 0x29b   : > { %1293 = vst.msk [vmem:[%s2039_s25 + $0x2c] sm:$0x1] %vm653_vm12, %v1272_v35 }
 0x29c   : > { %1281 = vrot.lane.b32.xlu1 %v2269_v53, %s1903_s11  ;;  %1474 = vrot.lane.b32.xlu0 %v1441_v30, %s1905_s19 }
 0x29e   : > { %v1146_v25 = vpop.permute.xlu1 %1145  ;;  %v1276_v22 = vpop.permute.xlu0 %1275 }
 0x29f   : > { %1166 = vst.msk [vmem:[%s2039_s25 + $0x38] sm:$0x1] %vm653_vm12, %v1146_v25  ;;  %1295 = vst.msk [vmem:[%s2039_s25 + $0x4c] sm:$0x1] %vm653_vm12, %v1276_v22 }
 0x2a0   : > { %1460 = vrot.lane.b32.xlu1 %v1413_v42, %s1905_s19  ;;  %1596 = vrot.lane.b32.xlu0 %v2283_v46, %s1893_s26 }
 0x2a2   : > { %v1150_v39 = vpop.permute.xlu1 %1149  ;;  %v1447_v30 = vpop.permute.xlu0 %1446 }
 0x2a3   : > { %1168 = vst.msk [vmem:[%s2039_s25 + $0x58] sm:$0x1] %vm653_vm12, %v1150_v39  ;;  %v1479_v42 = vsel %vm1478_vm14, %v1447_v30, %v2544_v63 }
 0x2a4   : > { %1476 = vrot.lane.b32.xlu1 %v1445_v61, %s1905_s19  ;;  %1495 = vst.msk [vmem:[%s2039_s25 + $0xe] sm:$0x1] %vm653_vm12, %v1479_v42 }
 0x2a6   : > { %v1178_v47 = vpop.permute.xlu1 %1177  ;;  %v1463_v46 = vpop.permute.xlu0 %1462 }
 0x2a7   : > { %1198 = vst.msk [vmem:[%s2039_s25 + $0x39] sm:$0x1] %vm653_vm12, %v1178_v47  ;;  %v1483_v10 = vsel %vm1478_vm14, %v1463_v46, %v2556_v1 }
 0x2a8   : > { %1313 = vrot.lane.b32.xlu1 %v2269_v53, %s1904_s17  ;;  %1499 = vst.msk [vmem:[%s2039_s25 + $0x4e] sm:$0x1] %vm653_vm12, %v1483_v10 }
 0x2aa   : > { %v1182_v61 = vpop.permute.xlu1 %1181  ;;  %v1304_v15 = vpop.permute.xlu0 %1303 }
 0x2ab   : > { %1200 = vst.msk [vmem:[%s2039_s25 + $0x59] sm:$0x1] %vm653_vm12, %v1182_v61  ;;  %1325 = vst.msk [vmem:[%s2039_s25 + $0x2d] sm:$0x1] %vm653_vm12, %v1304_v15 }
 0x2ac   : > { %1598 = vrot.lane.b32.xlu1 %v2288_v33, %s1893_s26 }
 0x2ae   : > { %v1210_v16 = vpop.permute.xlu1 %1209  ;;  %v1308_v53 = vpop.permute.xlu0 %1307 }
 0x2af   : > { %1230 = vst.msk [vmem:[%s2039_s25 + $0x3a] sm:$0x1] %vm653_vm12, %v1210_v16  ;;  %1327 = vst.msk [vmem:[%s2039_s25 + $0x4d] sm:$0x1] %vm653_vm12, %v1308_v53 }
 0x2b2   : > { %v1214_v36 = vpop.permute.xlu1 %1213  ;;  %v707_v24 = vpop.permute.xlu0 %706 }
 0x2b3   : > { %1232 = vst.msk [vmem:[%s2039_s25 + $0x5a] sm:$0x1] %vm653_vm12, %v1214_v36  ;;  %724 = vst.msk [vmem:[%s2039_s25 + $0x61] sm:$0x1] %vm653_vm12, %v707_v24 }
 0x2b6   : > { %v1242_v33 = vpop.permute.xlu1 %1241  ;;  %v739_v27 = vpop.permute.xlu0 %738 }
 0x2b7   : > { %1262 = vst.msk [vmem:[%s2039_s25 + $0x3b] sm:$0x1] %vm653_vm12, %v1242_v33  ;;  %756 = vst.msk [vmem:[%s2039_s25 + $0x62] sm:$0x1] %vm653_vm12, %v739_v27 }
 0x2ba   : > { %v1246_v31 = vpop.permute.xlu1 %1245  ;;  %v771_v40 = vpop.permute.xlu0 %770 }
 0x2bb   : > { %1264 = vst.msk [vmem:[%s2039_s25 + $0x5b] sm:$0x1] %vm653_vm12, %v1246_v31  ;;  %788 = vst.msk [vmem:[%s2039_s25 + $0x63] sm:$0x1] %vm653_vm12, %v771_v40 }
 0x2be   : > { %v1274_v18 = vpop.permute.xlu1 %1273  ;;  %v803_v20 = vpop.permute.xlu0 %802 }
 0x2bf   : > { %1294 = vst.msk [vmem:[%s2039_s25 + $0x3c] sm:$0x1] %vm653_vm12, %v1274_v18  ;;  %820 = vst.msk [vmem:[%s2039_s25 + $0x64] sm:$0x1] %vm653_vm12, %v803_v20 }
 0x2c2   : > { %v1278_v3 = vpop.permute.xlu1 %1277  ;;  %v835_v63 = vpop.permute.xlu0 %834 }
 0x2c3   : > { %1296 = vst.msk [vmem:[%s2039_s25 + $0x5c] sm:$0x1] %vm653_vm12, %v1278_v3  ;;  %852 = vst.msk [vmem:[%s2039_s25 + $0x65] sm:$0x1] %vm653_vm12, %v835_v63 }
 0x2c6   : > { %v1453_v44 = vpop.permute.xlu1 %1452  ;;  %v867_v1 = vpop.permute.xlu0 %866 }
 0x2c7   : > { %884 = vst.msk [vmem:[%s2039_s25 + $0x66] sm:$0x1] %vm653_vm12, %v867_v1 }
 0x2ca   : > { %v1457_v54 = vpop.permute.xlu1 %1456  ;;  %v1006_v28 = vpop.permute.xlu0 %1005 }
 0x2cb   : > { %v1035_v37 = vsel %vm1033_vm13, %v1006_v28, %v2686_v26 }
 0x2cc   : > { %1051 = vst.msk [vmem:[%s2039_s25 + $0x17] sm:$0x1] %vm653_vm12, %v1035_v37 }
 0x2ce   : > { %v1469_v38 = vpop.permute.xlu1 %1468  ;;  %v1010_v59 = vpop.permute.xlu0 %1009 }
 0x2cf   : > { %v1036_v4 = vsel %vm1033_vm13, %v1010_v59, %v2696_v50 }
 0x2d0   : > { %1052 = vst.msk [vmem:[%s2039_s25 + $0x27] sm:$0x1] %vm653_vm12, %v1036_v4 }
 0x2d2   : > { %v1473_v48 = vpop.permute.xlu1 %1472  ;;  %v1022_v52 = vpop.permute.xlu0 %1021 }
 0x2d3   : > { %v1039_v6 = vsel %vm1033_vm13, %v1022_v52, %v2706_v34 }
 0x2d4   : > { %1055 = vst.msk [vmem:[%s2039_s25 + $0x57] sm:$0x1] %vm653_vm12, %v1039_v6 }
 0x2d6   : > { %v1306_v43 = vpop.permute.xlu1 %1305  ;;  %v1026_v2 = vpop.permute.xlu0 %1025 }
 0x2d7   : > { %1326 = vst.msk [vmem:[%s2039_s25 + $0x3d] sm:$0x1] %vm653_vm12, %v1306_v43  ;;  %v1040_v7 = vsel %vm1033_vm13, %v1026_v2, %v2716_v14 }
 0x2d8   : > { %1056 = vst.msk [vmem:[%s2039_s25 + $0x67] sm:$0x1] %vm653_vm12, %v1040_v7 }
 0x2da   : > { %v1310_v8 = vpop.permute.xlu1 %1309  ;;  %v1152_v11 = vpop.permute.xlu0 %1151 }
 0x2db   : > { %1328 = vst.msk [vmem:[%s2039_s25 + $0x5d] sm:$0x1] %vm653_vm12, %v1310_v8  ;;  %1169 = vst.msk [vmem:[%s2039_s25 + $0x68] sm:$0x1] %vm653_vm12, %v1152_v11 }
 0x2de   : > { %v709_v9 = vpop.permute.xlu1 %708  ;;  %v1184_v45 = vpop.permute.xlu0 %1183 }
 0x2df   : > { %725 = vst.msk [vmem:[%s2039_s25 + $0x71] sm:$0x1] %vm653_vm12, %v709_v9  ;;  %1201 = vst.msk [vmem:[%s2039_s25 + $0x69] sm:$0x1] %vm653_vm12, %v1184_v45 }
 0x2e2   : > { %v741_v19 = vpop.permute.xlu1 %740  ;;  %v1216_v56 = vpop.permute.xlu0 %1215 }
 0x2e3   : > { %757 = vst.msk [vmem:[%s2039_s25 + $0x72] sm:$0x1] %vm653_vm12, %v741_v19  ;;  %1233 = vst.msk [vmem:[%s2039_s25 + $0x6a] sm:$0x1] %vm653_vm12, %v1216_v56 }
 0x2e6   : > { %v773_v21 = vpop.permute.xlu1 %772  ;;  %v1248_v49 = vpop.permute.xlu0 %1247 }
 0x2e7   : > { %789 = vst.msk [vmem:[%s2039_s25 + $0x73] sm:$0x1] %vm653_vm12, %v773_v21  ;;  %1265 = vst.msk [vmem:[%s2039_s25 + $0x6b] sm:$0x1] %vm653_vm12, %v1248_v49 }
 0x2ea   : > { %v805_v12 = vpop.permute.xlu1 %804  ;;  %v1280_v60 = vpop.permute.xlu0 %1279 }
 0x2eb   : > { %821 = vst.msk [vmem:[%s2039_s25 + $0x74] sm:$0x1] %vm653_vm12, %v805_v12  ;;  %1297 = vst.msk [vmem:[%s2039_s25 + $0x6c] sm:$0x1] %vm653_vm12, %v1280_v60 }
 0x2ee   : > { %v837_v55 = vpop.permute.xlu1 %836  ;;  %v1451_v17 = vpop.permute.xlu0 %1450 }
 0x2ef   : > { %853 = vst.msk [vmem:[%s2039_s25 + $0x75] sm:$0x1] %vm653_vm12, %v837_v55  ;;  %v1480_v57 = vsel %vm1478_vm14, %v1451_v17, %v1453_v44 }
 0x2f0   : > { %1496 = vst.msk [vmem:[%s2039_s25 + $0x1e] sm:$0x1] %vm653_vm12, %v1480_v57 }
 0x2f2   : > { %v869_v23 = vpop.permute.xlu1 %868  ;;  %v1455_v0 = vpop.permute.xlu0 %1454 }
 0x2f3   : > { %885 = vst.msk [vmem:[%s2039_s25 + $0x76] sm:$0x1] %vm653_vm12, %v869_v23  ;;  %v1481_v41 = vsel %vm1478_vm14, %v1455_v0, %v1457_v54 }
 0x2f4   : > { %1497 = vst.msk [vmem:[%s2039_s25 + $0x2e] sm:$0x1] %vm653_vm12, %v1481_v41 }
 0x2f6   : > { %v1016_v62 = vpop.permute.xlu1 %1015  ;;  %v1467_v58 = vpop.permute.xlu0 %1466 }
 0x2f7   : > { %v1484_v26 = vsel %vm1478_vm14, %v1467_v58, %v1469_v38 }
 0x2f8   : > { %1500 = vst.msk [vmem:[%s2039_s25 + $0x5e] sm:$0x1] %vm653_vm12, %v1484_v26 }
 0x2fa   : > { %v1032_v32 = vpop.permute.xlu1 %1031  ;;  %v1471_v5 = vpop.permute.xlu0 %1470 }
 0x2fb   : > { %v1485_v50 = vsel %vm1478_vm14, %v1471_v5, %v1473_v48 }
 0x2fc   : > { %1501 = vst.msk [vmem:[%s2039_s25 + $0x6e] sm:$0x1] %vm653_vm12, %v1485_v50 }
 0x2fe   : > { %v1154_v13 = vpop.permute.xlu1 %1153  ;;  %v1312_v29 = vpop.permute.xlu0 %1311 }
 0x2ff   : > { %1170 = vst.msk [vmem:[%s2039_s25 + $0x78] sm:$0x1] %vm653_vm12, %v1154_v13  ;;  %1329 = vst.msk [vmem:[%s2039_s25 + $0x6d] sm:$0x1] %vm653_vm12, %v1312_v29 }
 0x302   : > { %v1186_v34 = vpop.permute.xlu1 %1185  ;;  %v1014_v51 = vpop.permute.xlu0 %1013 }
 0x303   : > { %1202 = vst.msk [vmem:[%s2039_s25 + $0x79] sm:$0x1] %vm653_vm12, %v1186_v34  ;;  %v1037_v14 = vsel %vm1033_vm13, %v1014_v51, %v1016_v62 }
 0x304   : > { %1053 = vst.msk [vmem:[%s2039_s25 + $0x37] sm:$0x1] %vm653_vm12, %v1037_v14 }
 0x306   : > { %v1218_v35 = vpop.permute.xlu1 %1217  ;;  %v1030_v25 = vpop.permute.xlu0 %1029 }
 0x307   : > { %1234 = vst.msk [vmem:[%s2039_s25 + $0x7a] sm:$0x1] %vm653_vm12, %v1218_v35  ;;  %v1041_v22 = vsel %vm1033_vm13, %v1030_v25, %v1032_v32 }
 0x308   : > { %1057 = vst.msk [vmem:[%s2039_s25 + $0x77] sm:$0x1] %vm653_vm12, %v1041_v22 }
 0x30a   : > { %v1250_v39 = vpop.permute.xlu1 %1249  ;;  %v1459_v30 = vpop.permute.xlu0 %1458 }
 0x30b   : > { %1266 = vst.msk [vmem:[%s2039_s25 + $0x7b] sm:$0x1] %vm653_vm12, %v1250_v39 }
 0x30e   : > { %v1282_v42 = vpop.permute.xlu1 %1281  ;;  %v1475_v47 = vpop.permute.xlu0 %1474 }
 0x30f   : > { %1298 = vst.msk [vmem:[%s2039_s25 + $0x7c] sm:$0x1] %vm653_vm12, %v1282_v42 }
 0x312   : > { %v1461_v46 = vpop.permute.xlu1 %1460  ;;  %v1597_v61 = vpop.permute.xlu0 %1596 }
 0x313   : > { %v1482_v10 = vsel %vm1478_vm14, %v1459_v30, %v1461_v46  ;;  %1614 = vst.msk [vmem:[%s2039_s25 + $0x6f] sm:$0x1] %vm653_vm12, %v1597_v61 }
 0x314   : > { %1498 = vst.msk [vmem:[%s2039_s25 + $0x3e] sm:$0x1] %vm653_vm12, %v1482_v10 }
 0x316   : > { %v1477_v15 = vpop.permute.xlu1 %1476 }
 0x317   : > { %v1486_v16 = vsel %vm1478_vm14, %v1475_v47, %v1477_v15 }
 0x318   : > { %1502 = vst.msk [vmem:[%s2039_s25 + $0x7e] sm:$0x1] %vm653_vm12, %v1486_v16 }
 0x31a   : > { %v1314_v53 = vpop.permute.xlu1 %1313 }
 0x31b   : > { %1330 = vst.msk [vmem:[%s2039_s25 + $0x7d] sm:$0x1] %vm653_vm12, %v1314_v53 }
 0x31e   : > { %v1599_v36 = vpop.permute.xlu1 %1598 }
 0x31f   : > { %1615 = vst.msk [vmem:[%s2039_s25 + $0x7f] sm:$0x1] %vm653_vm12, %v1599_v36 }
 0x320   : > { %1829 = shalt.err (!%p1826_p3)
}
 0x321   : > { %s1830_s20 = scalar_lea.hbm %s2873_s27, 2048  ;;  %s1834_s8 = scalar_lea.hbm %s2925_s3, 4096 }
 0x322   : > { %p1831_p4 = scmp.ne.s32.totalorder %s2873_s27, %s1830_s20  ;;  %p1835_p9 = scmp.lt.u32.totalorder %s2873_s27, %s2925_s3 }
 0x323   : > { %p1836_p10 = scmp.lt.u32.totalorder %s1834_s8, %s1830_s20  ;;  %p1838_p12 = scmp.lt.u32.totalorder %s1830_s20, %s2873_s27 }
 0x324   : > { %p1832_p7 = pnand %p1831_p4, %p1967_p5 }
 0x325   : > { %p1837_p11 = por %p1836_p10, %p1835_p9 }
 0x326   : > { %p1833_p8 = pneg %p1832_p7 }
 0x327   : > { %p1839_p13 = por %p1838_p12, %p1837_p11 }
 0x329   : > { %p1840_p0 = pnand %p1839_p13, %p1833_p8 }
 0x32b   : > { %1843 = shalt.err (!%p1840_p0)
}
 0x32c   : > { %s1907_s11 = smov 128   ;;  %s1908_s17 = smov 8  }
 0x32d   : > { %1734 = dma.vmem_to_hbm [thread:$0]  (%p1967_p5), %s2875_s7, 2048, %s2873_s27, %s2881_s28, %s1907_s11, %s1907_s11, %s1908_s17  }
 0x32e PF: > { %p1740_p1 = scmp.ge.s32.totalorder %s1878_s15, 2  ;;  %s1645_s19 = sand.u32 1, %s1866_s12  }
 0x32f   : > { %s1646_s4 = scalar_lea.sflag [#allocation4], %s1645_s19 }
 0x330   : > { %p1737_p2 = pnand %p1740_p1, %p1971_p6 }
 0x332   : > { %1861 = dma.done.wait (!%p1737_p2), %s1646_s4, 2048  }
 0x333   : > { %1863 = vsyncadd (!%p1737_p2), %s1646_s4, 4294965248  ;;  %p13_p3 = scmp.ge.s32.totalorder %s1954_s18, 4   ;;  %s2933_s12 = smov %s1870_s13 }
 0x334   : > { %s2934_s13 = smov %s1874_s14  ;;  %s2935_s14 = smov %s1965_s21 }
 0x335   : > { %s2936_s15 = smov %s1954_s18  ;;  %15 = sbr.rel (!%p13_p3) target bundleno = 3 (0x3), region = 67 }
 0x33c   :  { %1651 = vsyncpa [#allocation4], 1 }
 0x33d   :  { %1653 = vsyncpa [#allocation4 + $0x1], 1 }

</bundles_post_ra>
